<compile_context>
chip_gen: v7x
topology: tpu7x:2x2x1
jax: 0.10.0
libtpu: 0.0.40
codegen_flags: <defaults>
</compile_context>

<pallas_src>
import functools

import jax
import jax.numpy as jnp
from jax.experimental import pallas as pl
from jax.experimental.pallas import tpu as pltpu  # noqa: F401  (TPU backend assumed)


def _apply_gates(gates, c_prev, H):
    """LSTM gate math with gates laid out [i | f | o | g] (each width H)."""
    sig = jax.nn.sigmoid(gates[:, :3 * H])   # i, f, o in a single EUP pass
    g_g = jnp.tanh(gates[:, 3 * H:])         # g in a single EUP pass
    i_g = sig[:, 0 * H:1 * H]
    f_g = sig[:, 1 * H:2 * H]
    o_g = sig[:, 2 * H:3 * H]
    c_new = f_g * c_prev + i_g * g_g
    h_new = o_g * jnp.tanh(c_new)
    return h_new, c_new


def _lstm_kernel(seq_len, batch, hidden,
                 x_ref,      # (S*B, I)   seq-major, batch-padded
                 wih1_ref,   # (I, 4H)    gate-permuted to [i|f|o|g]
                 whh1_ref,   # (H, 4H)
                 b1_ref,     # (1, 4H)    b_ih + b_hh, layer 1
                 w2_ref,     # (2H, 4H)   fused [W_ih2 ; W_hh2]
                 b2_ref,     # (1, 4H)    b_ih + b_hh, layer 2
                 wfc_ref,    # (H, O_pad) column-padded to a 128-lane multiple
                 bfc_ref,    # (1, O_pad)
                 out_ref):   # (B, O_pad)
    S, B, H = seq_len, batch, hidden

    # ---- hoisted layer-1 input projection (+ bias) for all timesteps ----
    pre1 = (jnp.dot(x_ref[...], wih1_ref[...],
                    preferred_element_type=jnp.float32)
            + b1_ref[...])                                   # (S*B, 4H)

    whh1 = whh1_ref[...]
    w2 = w2_ref[...]
    b2 = jnp.broadcast_to(b2_ref[...], (B, 4 * H))           # broadcast once

    h1 = jnp.zeros((B, H), jnp.float32)
    c1 = jnp.zeros((B, H), jnp.float32)
    h2 = jnp.zeros((B, H), jnp.float32)
    c2 = jnp.zeros((B, H), jnp.float32)
    acc = jnp.zeros((B, H), jnp.float32)

    # Fully-unrolled time recurrence (S is small and static); every slice is
    # static and sublane-aligned (B is a multiple of 8).
    for t in range(S):
        # layer 1: recurrent part only (input part precomputed above)
        g1 = pre1[t * B:(t + 1) * B, :] + jnp.dot(
            h1, whh1, preferred_element_type=jnp.float32)
        h1, c1 = _apply_gates(g1, c1, H)

        # layer 2: fused [x_t | h_{t-1}] @ [W_ih ; W_hh]
        g2 = jnp.dot(jnp.concatenate([h1, h2], axis=1), w2,
                     preferred_element_type=jnp.float32) + b2
        h2, c2 = _apply_gates(g2, c2, H)

        acc = acc + h2

    # mean over the sequence, Linear head, sigmoid — lane-dense output store.
    mean_h = acc * (1.0 / S)
    logits = jnp.dot(mean_h, wfc_ref[...],
                     preferred_element_type=jnp.float32) + bfc_ref[...]
    out_ref[...] = jax.nn.sigmoid(logits)


def my_lstm_forward(x, params):
    """x: (B, S, I) float32. Returns (B, O) float32."""
    B, S, I = x.shape
    H = params["whh1"].shape[0]
    O = params["wfc"].shape[1]

    # Pad batch to the 8-row sublane granularity.
    B_pad = ((B + 7) // 8) * 8
    if B_pad != B:
        x = jnp.pad(x, ((0, B_pad - B), (0, 0), (0, 0)))

    # Pad FC output columns to a 128-lane multiple so the kernel's store is
    # unmasked (lane-dense out_spec). Padded columns are sliced off below.
    O_pad = max(((O + 127) // 128) * 128, 128)
    wfc = params["wfc"]
    bfc = params["bfc"]
    if O_pad != O:
        wfc = jnp.pad(wfc, ((0, 0), (0, O_pad - O)))
        bfc = jnp.pad(bfc, ((0, 0), (0, O_pad - O)))

    # seq-major, then flatten (S, B_pad, I) -> (S*B_pad, I) for the hoisted
    # one-shot input projection.
    x2 = jnp.transpose(x, (1, 0, 2)).reshape(S * B_pad, I)

    # Permute gate columns from PyTorch [i|f|g|o] to [i|f|o|g] so the sigmoid
    # gates form one contiguous slice inside the kernel.
    def perm(w):
        return jnp.concatenate(
            [w[:, :2 * H], w[:, 3 * H:4 * H], w[:, 2 * H:3 * H]], axis=1)

    wih1 = perm(params["wih1"])
    whh1 = perm(params["whh1"])
    b1 = perm(params["b1"])
    wih2 = perm(params["wih2"])
    whh2 = perm(params["whh2"])
    b2 = perm(params["b2"])
    w2 = jnp.concatenate([wih2, whh2], axis=0)   # (2H, 4H) fused layer-2 weight

    kernel = functools.partial(_lstm_kernel, S, B_pad, H)

    # Single grid point: every operand is loaded into VMEM in full (default
    # full-array BlockSpecs); the total footprint here is only tens of KB.
    out = pl.pallas_call(
        kernel,
        out_shape=jax.ShapeDtypeStruct((B_pad, O_pad), jnp.float32),
    )(x2, wih1, whh1, b1, w2, b2, wfc, bfc)

    return out[:B, :O]


def my_lstm_reference(x, params):
    """Pure-JAX reference of the PyTorch forward (eval mode), PyTorch gate order."""
    B, S, I = x.shape
    H = params["whh1"].shape[0]

    def cell(x_in, h, c, wih, whh, b):
        gates = x_in @ wih + h @ whh + b
        i_g = jax.nn.sigmoid(gates[:, 0 * H:1 * H])
        f_g = jax.nn.sigmoid(gates[:, 1 * H:2 * H])
        g_g = jnp.tanh(gates[:, 2 * H:3 * H])
        o_g = jax.nn.sigmoid(gates[:, 3 * H:4 * H])
        c = f_g * c + i_g * g_g
        h = o_g * jnp.tanh(c)
        return h, c

    h1 = c1 = h2 = c2 = jnp.zeros((B, H), jnp.float32)
    hs = []
    for t in range(S):
        h1, c1 = cell(x[:, t, :], h1, c1,
                      params["wih1"], params["whh1"], params["b1"])
        h2, c2 = cell(h1, h2, c2,
                      params["wih2"], params["whh2"], params["b2"])
        hs.append(h2)
    mean_h = jnp.mean(jnp.stack(hs, axis=1), axis=1)
    return jax.nn.sigmoid(mean_h @ params["wfc"] + params["bfc"])


def init_params(key, input_size, hidden_size, output_size):
    """Deterministic synthetic parameters (uniform, PyTorch-like scale).
    Weights are stored pre-transposed so the kernel does x @ W; gate order is
    the PyTorch order [i|f|g|o] (the wrapper handles any reordering)."""
    H = hidden_size
    ks = jax.random.split(key, 10)
    s = 1.0 / jnp.sqrt(H)
    u = lambda k, shape: jax.random.uniform(k, shape, jnp.float32, -s, s)
    return {
        # layer 1
        "wih1": u(ks[0], (input_size, 4 * H)),
        "whh1": u(ks[1], (H, 4 * H)),
        "b1":   u(ks[2], (1, 4 * H)) + u(ks[3], (1, 4 * H)),  # b_ih + b_hh
        # layer 2 (input is h1, size H)
        "wih2": u(ks[4], (H, 4 * H)),
        "whh2": u(ks[5], (H, 4 * H)),
        "b2":   u(ks[6], (1, 4 * H)) + u(ks[7], (1, 4 * H)),
        # fc
        "wfc":  u(ks[8], (H, output_size)),
        "bfc":  u(ks[9], (1, output_size)),
    }


if __name__ == "__main__":
    input_size, hidden_size, output_size = 16, 32, 8
    batch, seq = 4, 8

    key = jax.random.PRNGKey(0)
    k_x, k_p = jax.random.split(key)
    x = jax.random.normal(k_x, (batch, seq, input_size), jnp.float32)
    params = init_params(k_p, input_size, hidden_size, output_size)

    out = my_lstm_forward(x, params)
    out = jax.block_until_ready(out)

    ref = my_lstm_reference(x, params)
    assert out.shape == (batch, output_size)
    assert jnp.allclose(out, ref, rtol=1e-5, atol=1e-5), (
        f"max abs err {jnp.max(jnp.abs(out - ref))}")

    print("KERNEL_OK")
</pallas_src>

<mosaic_0001>
module attributes {stable_mosaic.version = 11 : i64} {
  func.func @_lstm_kernel(%arg0: memref<64x16xf32, #tpu.memory_space<vmem>>, %arg1: memref<16x128xf32, #tpu.memory_space<vmem>>, %arg2: memref<32x128xf32, #tpu.memory_space<vmem>>, %arg3: memref<1x128xf32, #tpu.memory_space<vmem>>, %arg4: memref<64x128xf32, #tpu.memory_space<vmem>>, %arg5: memref<1x128xf32, #tpu.memory_space<vmem>>, %arg6: memref<32x128xf32, #tpu.memory_space<vmem>>, %arg7: memref<1x128xf32, #tpu.memory_space<vmem>>, %arg8: memref<8x128xf32, #tpu.memory_space<vmem>>) attributes {dimension_semantics = [], scalar_prefetch = 0 : i64, scratch_operands = 0 : i64, tpu.core_type = #tpu.core_type<tc>} {
    %c0 = arith.constant 0 : index
    %c0_0 = arith.constant 0 : index
    %0 = vector.load %arg0[%c0, %c0_0] : memref<64x16xf32, #tpu.memory_space<vmem>>, vector<64x16xf32>
    %c0_1 = arith.constant 0 : index
    %c0_2 = arith.constant 0 : index
    %1 = vector.load %arg1[%c0_1, %c0_2] : memref<16x128xf32, #tpu.memory_space<vmem>>, vector<16x128xf32>
    %cst = arith.constant dense<0.000000e+00> : vector<64x128xf32>
    %2 = tpu.matmul %0, %1, %cst {dimension_numbers = #tpu.dot_dimension_numbers<[1], [0], [0], [1], [0, 0, 1, 1], [], []>} : vector<64x16xf32>, vector<16x128xf32>, vector<64x128xf32> -> vector<64x128xf32>
    %c0_3 = arith.constant 0 : index
    %c0_4 = arith.constant 0 : index
    %3 = vector.load %arg3[%c0_3, %c0_4] : memref<1x128xf32, #tpu.memory_space<vmem>>, vector<1x128xf32>
    %4 = vector.broadcast %3 : vector<1x128xf32> to vector<64x128xf32>
    %5 = arith.addf %2, %4 : vector<64x128xf32>
    %c0_5 = arith.constant 0 : index
    %c0_6 = arith.constant 0 : index
    %6 = vector.load %arg2[%c0_5, %c0_6] : memref<32x128xf32, #tpu.memory_space<vmem>>, vector<32x128xf32>
    %c0_7 = arith.constant 0 : index
    %c0_8 = arith.constant 0 : index
    %7 = vector.load %arg4[%c0_7, %c0_8] : memref<64x128xf32, #tpu.memory_space<vmem>>, vector<64x128xf32>
    %c0_9 = arith.constant 0 : index
    %c0_10 = arith.constant 0 : index
    %8 = vector.load %arg5[%c0_9, %c0_10] : memref<1x128xf32, #tpu.memory_space<vmem>>, vector<1x128xf32>
    %9 = vector.shape_cast %8 : vector<1x128xf32> to vector<1x128xf32>
    %10 = vector.broadcast %9 : vector<1x128xf32> to vector<8x128xf32>
    %cst_11 = arith.constant 0.000000e+00 : f32
    %11 = vector.broadcast %cst_11 : f32 to vector<8x32xf32>
    %cst_12 = arith.constant 0.000000e+00 : f32
    %12 = vector.broadcast %cst_12 : f32 to vector<8x32xf32>
    %cst_13 = arith.constant 0.000000e+00 : f32
    %13 = vector.broadcast %cst_13 : f32 to vector<8x32xf32>
    %cst_14 = arith.constant 0.000000e+00 : f32
    %14 = vector.broadcast %cst_14 : f32 to vector<8x32xf32>
    %cst_15 = arith.constant 0.000000e+00 : f32
    %15 = vector.broadcast %cst_15 : f32 to vector<8x32xf32>
    %16 = vector.extract_strided_slice %5 {offsets = [0, 0], sizes = [8, 128], strides = [1, 1]} : vector<64x128xf32> to vector<8x128xf32>
    %cst_16 = arith.constant dense<0.000000e+00> : vector<8x128xf32>
    %17 = tpu.matmul %11, %6, %cst_16 {dimension_numbers = #tpu.dot_dimension_numbers<[1], [0], [0], [1], [0, 0, 1, 1], [], []>} : vector<8x32xf32>, vector<32x128xf32>, vector<8x128xf32> -> vector<8x128xf32>
    %18 = arith.addf %16, %17 : vector<8x128xf32>
    %19 = vector.extract_strided_slice %18 {offsets = [0, 0], sizes = [8, 96], strides = [1, 1]} : vector<8x128xf32> to vector<8x96xf32>
    %20 = arith.negf %19 : vector<8x96xf32>
    %21 = math.exp %20 : vector<8x96xf32>
    %cst_17 = arith.constant 1.000000e+00 : f32
    %22 = vector.broadcast %cst_17 : f32 to vector<8x96xf32>
    %23 = arith.addf %22, %21 : vector<8x96xf32>
    %24 = arith.divf %22, %23 : vector<8x96xf32>
    %25 = vector.extract_strided_slice %18 {offsets = [0, 96], sizes = [8, 32], strides = [1, 1]} : vector<8x128xf32> to vector<8x32xf32>
    %26 = math.tanh %25 : vector<8x32xf32>
    %27 = vector.extract_strided_slice %24 {offsets = [0, 0], sizes = [8, 32], strides = [1, 1]} : vector<8x96xf32> to vector<8x32xf32>
    %28 = vector.extract_strided_slice %24 {offsets = [0, 32], sizes = [8, 32], strides = [1, 1]} : vector<8x96xf32> to vector<8x32xf32>
    %29 = vector.extract_strided_slice %24 {offsets = [0, 64], sizes = [8, 32], strides = [1, 1]} : vector<8x96xf32> to vector<8x32xf32>
    %30 = arith.mulf %28, %12 : vector<8x32xf32>
    %31 = arith.mulf %27, %26 : vector<8x32xf32>
    %32 = arith.addf %30, %31 : vector<8x32xf32>
    %33 = math.tanh %32 : vector<8x32xf32>
    %34 = arith.mulf %29, %33 : vector<8x32xf32>
    %35 = tpu.concatenate %34, %13 in 1 : vector<8x32xf32>, vector<8x32xf32> -> vector<8x64xf32>
    %cst_18 = arith.constant dense<0.000000e+00> : vector<8x128xf32>
    %36 = tpu.matmul %35, %7, %cst_18 {dimension_numbers = #tpu.dot_dimension_numbers<[1], [0], [0], [1], [0, 0, 1, 1], [], []>} : vector<8x64xf32>, vector<64x128xf32>, vector<8x128xf32> -> vector<8x128xf32>
    %37 = arith.addf %36, %10 : vector<8x128xf32>
    %38 = vector.extract_strided_slice %37 {offsets = [0, 0], sizes = [8, 96], strides = [1, 1]} : vector<8x128xf32> to vector<8x96xf32>
    %39 = arith.negf %38 : vector<8x96xf32>
    %40 = math.exp %39 : vector<8x96xf32>
    %cst_19 = arith.constant 1.000000e+00 : f32
    %41 = vector.broadcast %cst_19 : f32 to vector<8x96xf32>
    %42 = arith.addf %41, %40 : vector<8x96xf32>
    %43 = arith.divf %41, %42 : vector<8x96xf32>
    %44 = vector.extract_strided_slice %37 {offsets = [0, 96], sizes = [8, 32], strides = [1, 1]} : vector<8x128xf32> to vector<8x32xf32>
    %45 = math.tanh %44 : vector<8x32xf32>
    %46 = vector.extract_strided_slice %43 {offsets = [0, 0], sizes = [8, 32], strides = [1, 1]} : vector<8x96xf32> to vector<8x32xf32>
    %47 = vector.extract_strided_slice %43 {offsets = [0, 32], sizes = [8, 32], strides = [1, 1]} : vector<8x96xf32> to vector<8x32xf32>
    %48 = vector.extract_strided_slice %43 {offsets = [0, 64], sizes = [8, 32], strides = [1, 1]} : vector<8x96xf32> to vector<8x32xf32>
    %49 = arith.mulf %47, %14 : vector<8x32xf32>
    %50 = arith.mulf %46, %45 : vector<8x32xf32>
    %51 = arith.addf %49, %50 : vector<8x32xf32>
    %52 = math.tanh %51 : vector<8x32xf32>
    %53 = arith.mulf %48, %52 : vector<8x32xf32>
    %54 = arith.addf %15, %53 : vector<8x32xf32>
    %55 = vector.extract_strided_slice %5 {offsets = [8, 0], sizes = [8, 128], strides = [1, 1]} : vector<64x128xf32> to vector<8x128xf32>
    %cst_20 = arith.constant dense<0.000000e+00> : vector<8x128xf32>
    %56 = tpu.matmul %34, %6, %cst_20 {dimension_numbers = #tpu.dot_dimension_numbers<[1], [0], [0], [1], [0, 0, 1, 1], [], []>} : vector<8x32xf32>, vector<32x128xf32>, vector<8x128xf32> -> vector<8x128xf32>
    %57 = arith.addf %55, %56 : vector<8x128xf32>
    %58 = vector.extract_strided_slice %57 {offsets = [0, 0], sizes = [8, 96], strides = [1, 1]} : vector<8x128xf32> to vector<8x96xf32>
    %59 = arith.negf %58 : vector<8x96xf32>
    %60 = math.exp %59 : vector<8x96xf32>
    %cst_21 = arith.constant 1.000000e+00 : f32
    %61 = vector.broadcast %cst_21 : f32 to vector<8x96xf32>
    %62 = arith.addf %61, %60 : vector<8x96xf32>
    %63 = arith.divf %61, %62 : vector<8x96xf32>
    %64 = vector.extract_strided_slice %57 {offsets = [0, 96], sizes = [8, 32], strides = [1, 1]} : vector<8x128xf32> to vector<8x32xf32>
    %65 = math.tanh %64 : vector<8x32xf32>
    %66 = vector.extract_strided_slice %63 {offsets = [0, 0], sizes = [8, 32], strides = [1, 1]} : vector<8x96xf32> to vector<8x32xf32>
    %67 = vector.extract_strided_slice %63 {offsets = [0, 32], sizes = [8, 32], strides = [1, 1]} : vector<8x96xf32> to vector<8x32xf32>
    %68 = vector.extract_strided_slice %63 {offsets = [0, 64], sizes = [8, 32], strides = [1, 1]} : vector<8x96xf32> to vector<8x32xf32>
    %69 = arith.mulf %67, %32 : vector<8x32xf32>
    %70 = arith.mulf %66, %65 : vector<8x32xf32>
    %71 = arith.addf %69, %70 : vector<8x32xf32>
    %72 = math.tanh %71 : vector<8x32xf32>
    %73 = arith.mulf %68, %72 : vector<8x32xf32>
    %74 = tpu.concatenate %73, %53 in 1 : vector<8x32xf32>, vector<8x32xf32> -> vector<8x64xf32>
    %cst_22 = arith.constant dense<0.000000e+00> : vector<8x128xf32>
    %75 = tpu.matmul %74, %7, %cst_22 {dimension_numbers = #tpu.dot_dimension_numbers<[1], [0], [0], [1], [0, 0, 1, 1], [], []>} : vector<8x64xf32>, vector<64x128xf32>, vector<8x128xf32> -> vector<8x128xf32>
    %76 = arith.addf %75, %10 : vector<8x128xf32>
    %77 = vector.extract_strided_slice %76 {offsets = [0, 0], sizes = [8, 96], strides = [1, 1]} : vector<8x128xf32> to vector<8x96xf32>
    %78 = arith.negf %77 : vector<8x96xf32>
    %79 = math.exp %78 : vector<8x96xf32>
    %cst_23 = arith.constant 1.000000e+00 : f32
    %80 = vector.broadcast %cst_23 : f32 to vector<8x96xf32>
    %81 = arith.addf %80, %79 : vector<8x96xf32>
    %82 = arith.divf %80, %81 : vector<8x96xf32>
    %83 = vector.extract_strided_slice %76 {offsets = [0, 96], sizes = [8, 32], strides = [1, 1]} : vector<8x128xf32> to vector<8x32xf32>
    %84 = math.tanh %83 : vector<8x32xf32>
    %85 = vector.extract_strided_slice %82 {offsets = [0, 0], sizes = [8, 32], strides = [1, 1]} : vector<8x96xf32> to vector<8x32xf32>
    %86 = vector.extract_strided_slice %82 {offsets = [0, 32], sizes = [8, 32], strides = [1, 1]} : vector<8x96xf32> to vector<8x32xf32>
    %87 = vector.extract_strided_slice %82 {offsets = [0, 64], sizes = [8, 32], strides = [1, 1]} : vector<8x96xf32> to vector<8x32xf32>
    %88 = arith.mulf %86, %51 : vector<8x32xf32>
    %89 = arith.mulf %85, %84 : vector<8x32xf32>
    %90 = arith.addf %88, %89 : vector<8x32xf32>
    %91 = math.tanh %90 : vector<8x32xf32>
    %92 = arith.mulf %87, %91 : vector<8x32xf32>
    %93 = arith.addf %54, %92 : vector<8x32xf32>
    %94 = vector.extract_strided_slice %5 {offsets = [16, 0], sizes = [8, 128], strides = [1, 1]} : vector<64x128xf32> to vector<8x128xf32>
    %cst_24 = arith.constant dense<0.000000e+00> : vector<8x128xf32>
    %95 = tpu.matmul %73, %6, %cst_24 {dimension_numbers = #tpu.dot_dimension_numbers<[1], [0], [0], [1], [0, 0, 1, 1], [], []>} : vector<8x32xf32>, vector<32x128xf32>, vector<8x128xf32> -> vector<8x128xf32>
    %96 = arith.addf %94, %95 : vector<8x128xf32>
    %97 = vector.extract_strided_slice %96 {offsets = [0, 0], sizes = [8, 96], strides = [1, 1]} : vector<8x128xf32> to vector<8x96xf32>
    %98 = arith.negf %97 : vector<8x96xf32>
    %99 = math.exp %98 : vector<8x96xf32>
    %cst_25 = arith.constant 1.000000e+00 : f32
    %100 = vector.broadcast %cst_25 : f32 to vector<8x96xf32>
    %101 = arith.addf %100, %99 : vector<8x96xf32>
    %102 = arith.divf %100, %101 : vector<8x96xf32>
    %103 = vector.extract_strided_slice %96 {offsets = [0, 96], sizes = [8, 32], strides = [1, 1]} : vector<8x128xf32> to vector<8x32xf32>
    %104 = math.tanh %103 : vector<8x32xf32>
    %105 = vector.extract_strided_slice %102 {offsets = [0, 0], sizes = [8, 32], strides = [1, 1]} : vector<8x96xf32> to vector<8x32xf32>
    %106 = vector.extract_strided_slice %102 {offsets = [0, 32], sizes = [8, 32], strides = [1, 1]} : vector<8x96xf32> to vector<8x32xf32>
    %107 = vector.extract_strided_slice %102 {offsets = [0, 64], sizes = [8, 32], strides = [1, 1]} : vector<8x96xf32> to vector<8x32xf32>
    %108 = arith.mulf %106, %71 : vector<8x32xf32>
    %109 = arith.mulf %105, %104 : vector<8x32xf32>
    %110 = arith.addf %108, %109 : vector<8x32xf32>
    %111 = math.tanh %110 : vector<8x32xf32>
    %112 = arith.mulf %107, %111 : vector<8x32xf32>
    %113 = tpu.concatenate %112, %92 in 1 : vector<8x32xf32>, vector<8x32xf32> -> vector<8x64xf32>
    %cst_26 = arith.constant dense<0.000000e+00> : vector<8x128xf32>
    %114 = tpu.matmul %113, %7, %cst_26 {dimension_numbers = #tpu.dot_dimension_numbers<[1], [0], [0], [1], [0, 0, 1, 1], [], []>} : vector<8x64xf32>, vector<64x128xf32>, vector<8x128xf32> -> vector<8x128xf32>
    %115 = arith.addf %114, %10 : vector<8x128xf32>
    %116 = vector.extract_strided_slice %115 {offsets = [0, 0], sizes = [8, 96], strides = [1, 1]} : vector<8x128xf32> to vector<8x96xf32>
    %117 = arith.negf %116 : vector<8x96xf32>
    %118 = math.exp %117 : vector<8x96xf32>
    %cst_27 = arith.constant 1.000000e+00 : f32
    %119 = vector.broadcast %cst_27 : f32 to vector<8x96xf32>
    %120 = arith.addf %119, %118 : vector<8x96xf32>
    %121 = arith.divf %119, %120 : vector<8x96xf32>
    %122 = vector.extract_strided_slice %115 {offsets = [0, 96], sizes = [8, 32], strides = [1, 1]} : vector<8x128xf32> to vector<8x32xf32>
    %123 = math.tanh %122 : vector<8x32xf32>
    %124 = vector.extract_strided_slice %121 {offsets = [0, 0], sizes = [8, 32], strides = [1, 1]} : vector<8x96xf32> to vector<8x32xf32>
    %125 = vector.extract_strided_slice %121 {offsets = [0, 32], sizes = [8, 32], strides = [1, 1]} : vector<8x96xf32> to vector<8x32xf32>
    %126 = vector.extract_strided_slice %121 {offsets = [0, 64], sizes = [8, 32], strides = [1, 1]} : vector<8x96xf32> to vector<8x32xf32>
    %127 = arith.mulf %125, %90 : vector<8x32xf32>
    %128 = arith.mulf %124, %123 : vector<8x32xf32>
    %129 = arith.addf %127, %128 : vector<8x32xf32>
    %130 = math.tanh %129 : vector<8x32xf32>
    %131 = arith.mulf %126, %130 : vector<8x32xf32>
    %132 = arith.addf %93, %131 : vector<8x32xf32>
    %133 = vector.extract_strided_slice %5 {offsets = [24, 0], sizes = [8, 128], strides = [1, 1]} : vector<64x128xf32> to vector<8x128xf32>
    %cst_28 = arith.constant dense<0.000000e+00> : vector<8x128xf32>
    %134 = tpu.matmul %112, %6, %cst_28 {dimension_numbers = #tpu.dot_dimension_numbers<[1], [0], [0], [1], [0, 0, 1, 1], [], []>} : vector<8x32xf32>, vector<32x128xf32>, vector<8x128xf32> -> vector<8x128xf32>
    %135 = arith.addf %133, %134 : vector<8x128xf32>
    %136 = vector.extract_strided_slice %135 {offsets = [0, 0], sizes = [8, 96], strides = [1, 1]} : vector<8x128xf32> to vector<8x96xf32>
    %137 = arith.negf %136 : vector<8x96xf32>
    %138 = math.exp %137 : vector<8x96xf32>
    %cst_29 = arith.constant 1.000000e+00 : f32
    %139 = vector.broadcast %cst_29 : f32 to vector<8x96xf32>
    %140 = arith.addf %139, %138 : vector<8x96xf32>
    %141 = arith.divf %139, %140 : vector<8x96xf32>
    %142 = vector.extract_strided_slice %135 {offsets = [0, 96], sizes = [8, 32], strides = [1, 1]} : vector<8x128xf32> to vector<8x32xf32>
    %143 = math.tanh %142 : vector<8x32xf32>
    %144 = vector.extract_strided_slice %141 {offsets = [0, 0], sizes = [8, 32], strides = [1, 1]} : vector<8x96xf32> to vector<8x32xf32>
    %145 = vector.extract_strided_slice %141 {offsets = [0, 32], sizes = [8, 32], strides = [1, 1]} : vector<8x96xf32> to vector<8x32xf32>
    %146 = vector.extract_strided_slice %141 {offsets = [0, 64], sizes = [8, 32], strides = [1, 1]} : vector<8x96xf32> to vector<8x32xf32>
    %147 = arith.mulf %145, %110 : vector<8x32xf32>
    %148 = arith.mulf %144, %143 : vector<8x32xf32>
    %149 = arith.addf %147, %148 : vector<8x32xf32>
    %150 = math.tanh %149 : vector<8x32xf32>
    %151 = arith.mulf %146, %150 : vector<8x32xf32>
    %152 = tpu.concatenate %151, %131 in 1 : vector<8x32xf32>, vector<8x32xf32> -> vector<8x64xf32>
    %cst_30 = arith.constant dense<0.000000e+00> : vector<8x128xf32>
    %153 = tpu.matmul %152, %7, %cst_30 {dimension_numbers = #tpu.dot_dimension_numbers<[1], [0], [0], [1], [0, 0, 1, 1], [], []>} : vector<8x64xf32>, vector<64x128xf32>, vector<8x128xf32> -> vector<8x128xf32>
    %154 = arith.addf %153, %10 : vector<8x128xf32>
    %155 = vector.extract_strided_slice %154 {offsets = [0, 0], sizes = [8, 96], strides = [1, 1]} : vector<8x128xf32> to vector<8x96xf32>
    %156 = arith.negf %155 : vector<8x96xf32>
    %157 = math.exp %156 : vector<8x96xf32>
    %cst_31 = arith.constant 1.000000e+00 : f32
    %158 = vector.broadcast %cst_31 : f32 to vector<8x96xf32>
    %159 = arith.addf %158, %157 : vector<8x96xf32>
    %160 = arith.divf %158, %159 : vector<8x96xf32>
    %161 = vector.extract_strided_slice %154 {offsets = [0, 96], sizes = [8, 32], strides = [1, 1]} : vector<8x128xf32> to vector<8x32xf32>
    %162 = math.tanh %161 : vector<8x32xf32>
    %163 = vector.extract_strided_slice %160 {offsets = [0, 0], sizes = [8, 32], strides = [1, 1]} : vector<8x96xf32> to vector<8x32xf32>
    %164 = vector.extract_strided_slice %160 {offsets = [0, 32], sizes = [8, 32], strides = [1, 1]} : vector<8x96xf32> to vector<8x32xf32>
    %165 = vector.extract_strided_slice %160 {offsets = [0, 64], sizes = [8, 32], strides = [1, 1]} : vector<8x96xf32> to vector<8x32xf32>
    %166 = arith.mulf %164, %129 : vector<8x32xf32>
    %167 = arith.mulf %163, %162 : vector<8x32xf32>
    %168 = arith.addf %166, %167 : vector<8x32xf32>
    %169 = math.tanh %168 : vector<8x32xf32>
    %170 = arith.mulf %165, %169 : vector<8x32xf32>
    %171 = arith.addf %132, %170 : vector<8x32xf32>
    %172 = vector.extract_strided_slice %5 {offsets = [32, 0], sizes = [8, 128], strides = [1, 1]} : vector<64x128xf32> to vector<8x128xf32>
    %cst_32 = arith.constant dense<0.000000e+00> : vector<8x128xf32>
    %173 = tpu.matmul %151, %6, %cst_32 {dimension_numbers = #tpu.dot_dimension_numbers<[1], [0], [0], [1], [0, 0, 1, 1], [], []>} : vector<8x32xf32>, vector<32x128xf32>, vector<8x128xf32> -> vector<8x128xf32>
    %174 = arith.addf %172, %173 : vector<8x128xf32>
    %175 = vector.extract_strided_slice %174 {offsets = [0, 0], sizes = [8, 96], strides = [1, 1]} : vector<8x128xf32> to vector<8x96xf32>
    %176 = arith.negf %175 : vector<8x96xf32>
    %177 = math.exp %176 : vector<8x96xf32>
    %cst_33 = arith.constant 1.000000e+00 : f32
    %178 = vector.broadcast %cst_33 : f32 to vector<8x96xf32>
    %179 = arith.addf %178, %177 : vector<8x96xf32>
    %180 = arith.divf %178, %179 : vector<8x96xf32>
    %181 = vector.extract_strided_slice %174 {offsets = [0, 96], sizes = [8, 32], strides = [1, 1]} : vector<8x128xf32> to vector<8x32xf32>
    %182 = math.tanh %181 : vector<8x32xf32>
    %183 = vector.extract_strided_slice %180 {offsets = [0, 0], sizes = [8, 32], strides = [1, 1]} : vector<8x96xf32> to vector<8x32xf32>
    %184 = vector.extract_strided_slice %180 {offsets = [0, 32], sizes = [8, 32], strides = [1, 1]} : vector<8x96xf32> to vector<8x32xf32>
    %185 = vector.extract_strided_slice %180 {offsets = [0, 64], sizes = [8, 32], strides = [1, 1]} : vector<8x96xf32> to vector<8x32xf32>
    %186 = arith.mulf %184, %149 : vector<8x32xf32>
    %187 = arith.mulf %183, %182 : vector<8x32xf32>
    %188 = arith.addf %186, %187 : vector<8x32xf32>
    %189 = math.tanh %188 : vector<8x32xf32>
    %190 = arith.mulf %185, %189 : vector<8x32xf32>
    %191 = tpu.concatenate %190, %170 in 1 : vector<8x32xf32>, vector<8x32xf32> -> vector<8x64xf32>
    %cst_34 = arith.constant dense<0.000000e+00> : vector<8x128xf32>
    %192 = tpu.matmul %191, %7, %cst_34 {dimension_numbers = #tpu.dot_dimension_numbers<[1], [0], [0], [1], [0, 0, 1, 1], [], []>} : vector<8x64xf32>, vector<64x128xf32>, vector<8x128xf32> -> vector<8x128xf32>
    %193 = arith.addf %192, %10 : vector<8x128xf32>
    %194 = vector.extract_strided_slice %193 {offsets = [0, 0], sizes = [8, 96], strides = [1, 1]} : vector<8x128xf32> to vector<8x96xf32>
    %195 = arith.negf %194 : vector<8x96xf32>
    %196 = math.exp %195 : vector<8x96xf32>
    %cst_35 = arith.constant 1.000000e+00 : f32
    %197 = vector.broadcast %cst_35 : f32 to vector<8x96xf32>
    %198 = arith.addf %197, %196 : vector<8x96xf32>
    %199 = arith.divf %197, %198 : vector<8x96xf32>
    %200 = vector.extract_strided_slice %193 {offsets = [0, 96], sizes = [8, 32], strides = [1, 1]} : vector<8x128xf32> to vector<8x32xf32>
    %201 = math.tanh %200 : vector<8x32xf32>
    %202 = vector.extract_strided_slice %199 {offsets = [0, 0], sizes = [8, 32], strides = [1, 1]} : vector<8x96xf32> to vector<8x32xf32>
    %203 = vector.extract_strided_slice %199 {offsets = [0, 32], sizes = [8, 32], strides = [1, 1]} : vector<8x96xf32> to vector<8x32xf32>
    %204 = vector.extract_strided_slice %199 {offsets = [0, 64], sizes = [8, 32], strides = [1, 1]} : vector<8x96xf32> to vector<8x32xf32>
    %205 = arith.mulf %203, %168 : vector<8x32xf32>
    %206 = arith.mulf %202, %201 : vector<8x32xf32>
    %207 = arith.addf %205, %206 : vector<8x32xf32>
    %208 = math.tanh %207 : vector<8x32xf32>
    %209 = arith.mulf %204, %208 : vector<8x32xf32>
    %210 = arith.addf %171, %209 : vector<8x32xf32>
    %211 = vector.extract_strided_slice %5 {offsets = [40, 0], sizes = [8, 128], strides = [1, 1]} : vector<64x128xf32> to vector<8x128xf32>
    %cst_36 = arith.constant dense<0.000000e+00> : vector<8x128xf32>
    %212 = tpu.matmul %190, %6, %cst_36 {dimension_numbers = #tpu.dot_dimension_numbers<[1], [0], [0], [1], [0, 0, 1, 1], [], []>} : vector<8x32xf32>, vector<32x128xf32>, vector<8x128xf32> -> vector<8x128xf32>
    %213 = arith.addf %211, %212 : vector<8x128xf32>
    %214 = vector.extract_strided_slice %213 {offsets = [0, 0], sizes = [8, 96], strides = [1, 1]} : vector<8x128xf32> to vector<8x96xf32>
    %215 = arith.negf %214 : vector<8x96xf32>
    %216 = math.exp %215 : vector<8x96xf32>
    %cst_37 = arith.constant 1.000000e+00 : f32
    %217 = vector.broadcast %cst_37 : f32 to vector<8x96xf32>
    %218 = arith.addf %217, %216 : vector<8x96xf32>
    %219 = arith.divf %217, %218 : vector<8x96xf32>
    %220 = vector.extract_strided_slice %213 {offsets = [0, 96], sizes = [8, 32], strides = [1, 1]} : vector<8x128xf32> to vector<8x32xf32>
    %221 = math.tanh %220 : vector<8x32xf32>
    %222 = vector.extract_strided_slice %219 {offsets = [0, 0], sizes = [8, 32], strides = [1, 1]} : vector<8x96xf32> to vector<8x32xf32>
    %223 = vector.extract_strided_slice %219 {offsets = [0, 32], sizes = [8, 32], strides = [1, 1]} : vector<8x96xf32> to vector<8x32xf32>
    %224 = vector.extract_strided_slice %219 {offsets = [0, 64], sizes = [8, 32], strides = [1, 1]} : vector<8x96xf32> to vector<8x32xf32>
    %225 = arith.mulf %223, %188 : vector<8x32xf32>
    %226 = arith.mulf %222, %221 : vector<8x32xf32>
    %227 = arith.addf %225, %226 : vector<8x32xf32>
    %228 = math.tanh %227 : vector<8x32xf32>
    %229 = arith.mulf %224, %228 : vector<8x32xf32>
    %230 = tpu.concatenate %229, %209 in 1 : vector<8x32xf32>, vector<8x32xf32> -> vector<8x64xf32>
    %cst_38 = arith.constant dense<0.000000e+00> : vector<8x128xf32>
    %231 = tpu.matmul %230, %7, %cst_38 {dimension_numbers = #tpu.dot_dimension_numbers<[1], [0], [0], [1], [0, 0, 1, 1], [], []>} : vector<8x64xf32>, vector<64x128xf32>, vector<8x128xf32> -> vector<8x128xf32>
    %232 = arith.addf %231, %10 : vector<8x128xf32>
    %233 = vector.extract_strided_slice %232 {offsets = [0, 0], sizes = [8, 96], strides = [1, 1]} : vector<8x128xf32> to vector<8x96xf32>
    %234 = arith.negf %233 : vector<8x96xf32>
    %235 = math.exp %234 : vector<8x96xf32>
    %cst_39 = arith.constant 1.000000e+00 : f32
    %236 = vector.broadcast %cst_39 : f32 to vector<8x96xf32>
    %237 = arith.addf %236, %235 : vector<8x96xf32>
    %238 = arith.divf %236, %237 : vector<8x96xf32>
    %239 = vector.extract_strided_slice %232 {offsets = [0, 96], sizes = [8, 32], strides = [1, 1]} : vector<8x128xf32> to vector<8x32xf32>
    %240 = math.tanh %239 : vector<8x32xf32>
    %241 = vector.extract_strided_slice %238 {offsets = [0, 0], sizes = [8, 32], strides = [1, 1]} : vector<8x96xf32> to vector<8x32xf32>
    %242 = vector.extract_strided_slice %238 {offsets = [0, 32], sizes = [8, 32], strides = [1, 1]} : vector<8x96xf32> to vector<8x32xf32>
    %243 = vector.extract_strided_slice %238 {offsets = [0, 64], sizes = [8, 32], strides = [1, 1]} : vector<8x96xf32> to vector<8x32xf32>
    %244 = arith.mulf %242, %207 : vector<8x32xf32>
    %245 = arith.mulf %241, %240 : vector<8x32xf32>
    %246 = arith.addf %244, %245 : vector<8x32xf32>
    %247 = math.tanh %246 : vector<8x32xf32>
    %248 = arith.mulf %243, %247 : vector<8x32xf32>
    %249 = arith.addf %210, %248 : vector<8x32xf32>
    %250 = vector.extract_strided_slice %5 {offsets = [48, 0], sizes = [8, 128], strides = [1, 1]} : vector<64x128xf32> to vector<8x128xf32>
    %cst_40 = arith.constant dense<0.000000e+00> : vector<8x128xf32>
    %251 = tpu.matmul %229, %6, %cst_40 {dimension_numbers = #tpu.dot_dimension_numbers<[1], [0], [0], [1], [0, 0, 1, 1], [], []>} : vector<8x32xf32>, vector<32x128xf32>, vector<8x128xf32> -> vector<8x128xf32>
    %252 = arith.addf %250, %251 : vector<8x128xf32>
    %253 = vector.extract_strided_slice %252 {offsets = [0, 0], sizes = [8, 96], strides = [1, 1]} : vector<8x128xf32> to vector<8x96xf32>
    %254 = arith.negf %253 : vector<8x96xf32>
    %255 = math.exp %254 : vector<8x96xf32>
    %cst_41 = arith.constant 1.000000e+00 : f32
    %256 = vector.broadcast %cst_41 : f32 to vector<8x96xf32>
    %257 = arith.addf %256, %255 : vector<8x96xf32>
    %258 = arith.divf %256, %257 : vector<8x96xf32>
    %259 = vector.extract_strided_slice %252 {offsets = [0, 96], sizes = [8, 32], strides = [1, 1]} : vector<8x128xf32> to vector<8x32xf32>
    %260 = math.tanh %259 : vector<8x32xf32>
    %261 = vector.extract_strided_slice %258 {offsets = [0, 0], sizes = [8, 32], strides = [1, 1]} : vector<8x96xf32> to vector<8x32xf32>
    %262 = vector.extract_strided_slice %258 {offsets = [0, 32], sizes = [8, 32], strides = [1, 1]} : vector<8x96xf32> to vector<8x32xf32>
    %263 = vector.extract_strided_slice %258 {offsets = [0, 64], sizes = [8, 32], strides = [1, 1]} : vector<8x96xf32> to vector<8x32xf32>
    %264 = arith.mulf %262, %227 : vector<8x32xf32>
    %265 = arith.mulf %261, %260 : vector<8x32xf32>
    %266 = arith.addf %264, %265 : vector<8x32xf32>
    %267 = math.tanh %266 : vector<8x32xf32>
    %268 = arith.mulf %263, %267 : vector<8x32xf32>
    %269 = tpu.concatenate %268, %248 in 1 : vector<8x32xf32>, vector<8x32xf32> -> vector<8x64xf32>
    %cst_42 = arith.constant dense<0.000000e+00> : vector<8x128xf32>
    %270 = tpu.matmul %269, %7, %cst_42 {dimension_numbers = #tpu.dot_dimension_numbers<[1], [0], [0], [1], [0, 0, 1, 1], [], []>} : vector<8x64xf32>, vector<64x128xf32>, vector<8x128xf32> -> vector<8x128xf32>
    %271 = arith.addf %270, %10 : vector<8x128xf32>
    %272 = vector.extract_strided_slice %271 {offsets = [0, 0], sizes = [8, 96], strides = [1, 1]} : vector<8x128xf32> to vector<8x96xf32>
    %273 = arith.negf %272 : vector<8x96xf32>
    %274 = math.exp %273 : vector<8x96xf32>
    %cst_43 = arith.constant 1.000000e+00 : f32
    %275 = vector.broadcast %cst_43 : f32 to vector<8x96xf32>
    %276 = arith.addf %275, %274 : vector<8x96xf32>
    %277 = arith.divf %275, %276 : vector<8x96xf32>
    %278 = vector.extract_strided_slice %271 {offsets = [0, 96], sizes = [8, 32], strides = [1, 1]} : vector<8x128xf32> to vector<8x32xf32>
    %279 = math.tanh %278 : vector<8x32xf32>
    %280 = vector.extract_strided_slice %277 {offsets = [0, 0], sizes = [8, 32], strides = [1, 1]} : vector<8x96xf32> to vector<8x32xf32>
    %281 = vector.extract_strided_slice %277 {offsets = [0, 32], sizes = [8, 32], strides = [1, 1]} : vector<8x96xf32> to vector<8x32xf32>
    %282 = vector.extract_strided_slice %277 {offsets = [0, 64], sizes = [8, 32], strides = [1, 1]} : vector<8x96xf32> to vector<8x32xf32>
    %283 = arith.mulf %281, %246 : vector<8x32xf32>
    %284 = arith.mulf %280, %279 : vector<8x32xf32>
    %285 = arith.addf %283, %284 : vector<8x32xf32>
    %286 = math.tanh %285 : vector<8x32xf32>
    %287 = arith.mulf %282, %286 : vector<8x32xf32>
    %288 = arith.addf %249, %287 : vector<8x32xf32>
    %289 = vector.extract_strided_slice %5 {offsets = [56, 0], sizes = [8, 128], strides = [1, 1]} : vector<64x128xf32> to vector<8x128xf32>
    %cst_44 = arith.constant dense<0.000000e+00> : vector<8x128xf32>
    %290 = tpu.matmul %268, %6, %cst_44 {dimension_numbers = #tpu.dot_dimension_numbers<[1], [0], [0], [1], [0, 0, 1, 1], [], []>} : vector<8x32xf32>, vector<32x128xf32>, vector<8x128xf32> -> vector<8x128xf32>
    %291 = arith.addf %289, %290 : vector<8x128xf32>
    %292 = vector.extract_strided_slice %291 {offsets = [0, 0], sizes = [8, 96], strides = [1, 1]} : vector<8x128xf32> to vector<8x96xf32>
    %293 = arith.negf %292 : vector<8x96xf32>
    %294 = math.exp %293 : vector<8x96xf32>
    %cst_45 = arith.constant 1.000000e+00 : f32
    %295 = vector.broadcast %cst_45 : f32 to vector<8x96xf32>
    %296 = arith.addf %295, %294 : vector<8x96xf32>
    %297 = arith.divf %295, %296 : vector<8x96xf32>
    %298 = vector.extract_strided_slice %291 {offsets = [0, 96], sizes = [8, 32], strides = [1, 1]} : vector<8x128xf32> to vector<8x32xf32>
    %299 = math.tanh %298 : vector<8x32xf32>
    %300 = vector.extract_strided_slice %297 {offsets = [0, 0], sizes = [8, 32], strides = [1, 1]} : vector<8x96xf32> to vector<8x32xf32>
    %301 = vector.extract_strided_slice %297 {offsets = [0, 32], sizes = [8, 32], strides = [1, 1]} : vector<8x96xf32> to vector<8x32xf32>
    %302 = vector.extract_strided_slice %297 {offsets = [0, 64], sizes = [8, 32], strides = [1, 1]} : vector<8x96xf32> to vector<8x32xf32>
    %303 = arith.mulf %301, %266 : vector<8x32xf32>
    %304 = arith.mulf %300, %299 : vector<8x32xf32>
    %305 = arith.addf %303, %304 : vector<8x32xf32>
    %306 = math.tanh %305 : vector<8x32xf32>
    %307 = arith.mulf %302, %306 : vector<8x32xf32>
    %308 = tpu.concatenate %307, %287 in 1 : vector<8x32xf32>, vector<8x32xf32> -> vector<8x64xf32>
    %cst_46 = arith.constant dense<0.000000e+00> : vector<8x128xf32>
    %309 = tpu.matmul %308, %7, %cst_46 {dimension_numbers = #tpu.dot_dimension_numbers<[1], [0], [0], [1], [0, 0, 1, 1], [], []>} : vector<8x64xf32>, vector<64x128xf32>, vector<8x128xf32> -> vector<8x128xf32>
    %310 = arith.addf %309, %10 : vector<8x128xf32>
    %311 = vector.extract_strided_slice %310 {offsets = [0, 0], sizes = [8, 96], strides = [1, 1]} : vector<8x128xf32> to vector<8x96xf32>
    %312 = arith.negf %311 : vector<8x96xf32>
    %313 = math.exp %312 : vector<8x96xf32>
    %cst_47 = arith.constant 1.000000e+00 : f32
    %314 = vector.broadcast %cst_47 : f32 to vector<8x96xf32>
    %315 = arith.addf %314, %313 : vector<8x96xf32>
    %316 = arith.divf %314, %315 : vector<8x96xf32>
    %317 = vector.extract_strided_slice %310 {offsets = [0, 96], sizes = [8, 32], strides = [1, 1]} : vector<8x128xf32> to vector<8x32xf32>
    %318 = math.tanh %317 : vector<8x32xf32>
    %319 = vector.extract_strided_slice %316 {offsets = [0, 0], sizes = [8, 32], strides = [1, 1]} : vector<8x96xf32> to vector<8x32xf32>
    %320 = vector.extract_strided_slice %316 {offsets = [0, 32], sizes = [8, 32], strides = [1, 1]} : vector<8x96xf32> to vector<8x32xf32>
    %321 = vector.extract_strided_slice %316 {offsets = [0, 64], sizes = [8, 32], strides = [1, 1]} : vector<8x96xf32> to vector<8x32xf32>
    %322 = arith.mulf %320, %285 : vector<8x32xf32>
    %323 = arith.mulf %319, %318 : vector<8x32xf32>
    %324 = arith.addf %322, %323 : vector<8x32xf32>
    %325 = math.tanh %324 : vector<8x32xf32>
    %326 = arith.mulf %321, %325 : vector<8x32xf32>
    %327 = arith.addf %288, %326 : vector<8x32xf32>
    %cst_48 = arith.constant 1.250000e-01 : f32
    %328 = vector.broadcast %cst_48 : f32 to vector<8x32xf32>
    %329 = arith.mulf %327, %328 : vector<8x32xf32>
    %c0_49 = arith.constant 0 : index
    %c0_50 = arith.constant 0 : index
    %330 = vector.load %arg6[%c0_49, %c0_50] : memref<32x128xf32, #tpu.memory_space<vmem>>, vector<32x128xf32>
    %cst_51 = arith.constant dense<0.000000e+00> : vector<8x128xf32>
    %331 = tpu.matmul %329, %330, %cst_51 {dimension_numbers = #tpu.dot_dimension_numbers<[1], [0], [0], [1], [0, 0, 1, 1], [], []>} : vector<8x32xf32>, vector<32x128xf32>, vector<8x128xf32> -> vector<8x128xf32>
    %c0_52 = arith.constant 0 : index
    %c0_53 = arith.constant 0 : index
    %332 = vector.load %arg7[%c0_52, %c0_53] : memref<1x128xf32, #tpu.memory_space<vmem>>, vector<1x128xf32>
    %333 = vector.broadcast %332 : vector<1x128xf32> to vector<8x128xf32>
    %334 = arith.addf %331, %333 : vector<8x128xf32>
    %335 = arith.negf %334 : vector<8x128xf32>
    %336 = math.exp %335 : vector<8x128xf32>
    %cst_54 = arith.constant 1.000000e+00 : f32
    %337 = vector.broadcast %cst_54 : f32 to vector<8x128xf32>
    %338 = arith.addf %337, %336 : vector<8x128xf32>
    %339 = arith.divf %337, %338 : vector<8x128xf32>
    %c0_55 = arith.constant 0 : index
    %c0_56 = arith.constant 0 : index
    %340 = vector.load %arg8[%c0_55, %c0_56] : memref<8x128xf32, #tpu.memory_space<vmem>>, vector<8x128xf32>
    tpu.vector_store %arg8[%c0_55, %c0_56], %339 {strides = array<i32>} : memref<8x128xf32, #tpu.memory_space<vmem>>, vector<8x128xf32>,
    return
  }
}

</mosaic_0001>

<bundles_post_ra>
// kernel: tpu_custom_call.1
= control target key start
LH: loop header
LB: loop body
LE: loop exit
PB: predicated region body
PF: predicated region fallthrough
CT: control target
= control target key end

     0   :  { %13 = vsyncpa [#allocation3], 0  ;;  %s3279_s0 = inlined_call_operand.vmem [shape: f32[64,16], index: 0, kind: input, shape index: {}]   ;;  %s3280_s1 = inlined_call_operand.hbm [shape: f32[16,128], index: 1, kind: input, shape index: {}]   ;;  %s3281_s2 = inlined_call_operand.hbm [shape: f32[32,128], index: 2, kind: input, shape index: {}]   ;;  %s3282_s3 = inlined_call_operand.vmem [shape: f32[1,128], index: 3, kind: input, shape index: {}]   ;;  %s3283_s4 = inlined_call_operand.vmem [shape: f32[64,128], index: 4, kind: input, shape index: {}]   ;;  %s3284_s5 = inlined_call_operand.vmem [shape: f32[1,128], index: 5, kind: input, shape index: {}]   ;;  %s3285_s6 = inlined_call_operand.vmem [shape: f32[32,128], index: 6, kind: input, shape index: {}]   ;;  %s3286_s7 = inlined_call_operand.vmem [shape: f32[1,128], index: 7, kind: input, shape index: {}]   ;;  %s3287_s8 = inlined_call_operand.hbm [shape: f32[8,128], index: 8, kind: output, shape index: {}]  }
   0x1   :  { %14 = vsyncpa [#allocation6], 0 }
   0x2   :  { %15 = vsyncpa [#allocation4], 0  ;;  %s2772_s27 = smov [#allocation2]   ;;  %s2700_s9 = scalar_lea.hbm %s3280_s1, 256 }
   0x3   :  { %s23_s28 = sshll.u32 %s2772_s27, 4  ;;  %p2701_p0 = scmp.ne.s32.totalorder %s3280_s1, %s2700_s9  ;;  %s24_s28 = int_to_ptr.vmem [resolvable:$true] %s23_s28 }
   0x4   :  { %p2704_p1 = scmp.lt.u32.totalorder %s2700_s9, %s3280_s1 }
   0x6   :  { %p2706_p2 = pnand %p2704_p1, %p2701_p0 }
   0x8   :  { %2709 = shalt.err (!%p2706_p2)
}
   0x9   :  { %s2710_s14 = scalar_lea.vmem %s24_s28, 256  ;;  %p2715_p4 = scmp.lt.s32.totalorder %s24_s28, %s24_s28 }
   0xa   :  { %p2711_p3 = scmp.ne.s32.totalorder %s24_s28, %s2710_s14  ;;  %p2716_p5 = scmp.lt.s32.totalorder %s2710_s14, %s2710_s14 }
   0xc   :  { %p2717_p6 = por %p2716_p5, %p2715_p4 }
   0xe   :  { %p2718_p7 = pnand %p2717_p6, %p2711_p3 }
  0x10   :  { %2721 = shalt.err (!%p2718_p7)
}
  0x11   :  { %s2773_s15 = smov 128   ;;  %s2774_s16 = smov 8  }
  0x12   :  { %29 = dma.hbm_to_vmem [thread:$0]  %s3280_s1, 256, %s24_s28, [#allocation3], %s2773_s15, %s2773_s15, %s2774_s16  }
  0x13   :  { %s2775_s19 = smov [#allocation5]   ;;  %s2722_s23 = scalar_lea.hbm %s3281_s2, 512 }
  0x14   :  { %s35_s20 = sshll.u32 %s2775_s19, 4  ;;  %p2723_p8 = scmp.ne.s32.totalorder %s3281_s2, %s2722_s23  ;;  %s36_s20 = int_to_ptr.vmem [resolvable:$true] %s35_s20 }
  0x15   :  { %p2726_p9 = scmp.lt.u32.totalorder %s2722_s23, %s3281_s2 }
  0x17   :  { %p2728_p10 = pnand %p2726_p9, %p2723_p8 }
  0x19   :  { %2731 = shalt.err (!%p2728_p10)
}
  0x1a   :  { %s2732_s29 = scalar_lea.vmem %s36_s20, 512  ;;  %p2737_p12 = scmp.lt.s32.totalorder %s36_s20, %s36_s20 }
  0x1b   :  { %p2733_p11 = scmp.ne.s32.totalorder %s36_s20, %s2732_s29  ;;  %p2738_p13 = scmp.lt.s32.totalorder %s2732_s29, %s2732_s29 }
  0x1d   :  { %p2739_p0 = por %p2738_p13, %p2737_p12 }
  0x1f   :  { %p2740_p1 = pnand %p2739_p0, %p2733_p11 }
  0x21   :  { %2743 = shalt.err (!%p2740_p1)
}
  0x22   :  { %41 = dma.hbm_to_vmem [thread:$0]  %s3281_s2, 512, %s36_s20, [#allocation6], %s2773_s15, %s2773_s15, %s2774_s16  }
  0x23   :  { %2766 = dma.done.wait [#allocation3], 256  }
  0x24   :  { %2767 = vsyncadd [#allocation3], 4294967040 }
  0x25   :  { %2768 = dma.done.wait [#allocation6], 512  }
  0x26   :  { %2769 = vsyncadd [#allocation6], 4294966784  ;;  %v2776_v0 = vmov 0.0|0.0   ;;  %vm2777_vm0 = vmmov 0   ;;  %v2778_v1 = vmov 0.0   ;;  %vm75_vm1 = vcmask 130048  }
  0x27   :  { %2407 = vmatprep.subr.bf16.mxu1 %v2776_v0  ;;  %2160 = vmatprep.mubr.msk.f32.mxu1 %vm2777_vm0, %v2778_v1  ;;  %v66_v2 = vld [vmem:[#allocation2] sm:$0xff]  ;;  %v67_v3 = vld [vmem:[#allocation2 + $0x8] sm:$0xff]  ;;  %v205_v4 = vld [vmem:[#allocation5] sm:$0xff]  ;;  %s2779_s13 = smov 32   ;;  %vm224_vm2 = vcmask 261120   ;;  %vm328_vm3 = vcmask 523264  }
  0x28   :  { %v2403_v5 = vpack.c.bf16 %v67_v3, %v66_v2  ;;  %v206_v6 = vld [vmem:[#allocation5 + $0x8] sm:$0xff]  ;;  %v58_v7 = vld [vmem:[%s3279_s0] sm:$0xff]  ;;  %v208_v10 = vld [vmem:[#allocation5 + $0x18] sm:$0xff] }
  0x29   :  { %v2858_v8 = vpack.c.bf16 %v206_v6, %v205_v4  ;;  %2140 = vmatprep.mubr.msk.f32.mxu0 %vm75_vm1, %v58_v7  ;;  %v207_v9 = vld [vmem:[#allocation5 + $0x10] sm:$0xff]  ;;  %v59_v11 = vld [vmem:[%s3279_s0 + $0x8] sm:$0xff]  ;;  %v60_v32 = vld [vmem:[%s3279_s0 + $0x10] sm:$0xff] }
  0x2a   :  { %2404 = vmatprep.subr.bf16.mxu0 %v2403_v5  ;;  %v2865_v12 = vpack.c.bf16 %v208_v10, %v207_v9  ;;  %v2882_v13 = vld [vmem:[%s3282_s3] ss:$0 sm:$0xff]  ;;  %v210_v31 = vld [vmem:[%s3283_s4 + $0x8] sm:$0xff]  ;;  %v61_v34 = vld [vmem:[%s3279_s0 + $0x18] sm:$0xff] }
  0x2b   :  { %2409 = vmatpush3.bf16.msra.mxu1 %v2858_v8  ;;  %2406 = vmatpush3.bf16.msra.mxu0 %v2403_v5  ;;  %v209_v30 = vld [vmem:[%s3283_s4] sm:$0xff]  ;;  %v211_v35 = vld [vmem:[%s3283_s4 + $0x10] sm:$0xff]  ;;  %v212_v36 = vld [vmem:[%s3283_s4 + $0x18] sm:$0xff] }
  0x2c   :  { %2410 = vmatprep.subr.bf16.mxu1 %v2776_v0  ;;  %2413 = vmatprep.subr.bf16.mxu0 %v2776_v0  ;;  %v2901_v33 = vpack.c.bf16 %v210_v31, %v209_v30  ;;  %v62_v37 = vld [vmem:[%s3279_s0 + $0x20] sm:$0xff]  ;;  %v2918_v38 = vpack.c.bf16 %v212_v36, %v211_v35  ;;  %v63_v39 = vld [vmem:[%s3279_s0 + $0x28] sm:$0xff]  ;;  %v64_v42 = vld [vmem:[%s3279_s0 + $0x30] sm:$0xff] }
  0x2d   :  { %v213_v40 = vld [vmem:[%s3283_s4 + $0x20] sm:$0xff]  ;;  %v214_v41 = vld [vmem:[%s3283_s4 + $0x28] sm:$0xff]  ;;  %v65_v44 = vld [vmem:[%s3279_s0 + $0x38] sm:$0xff]  ;;  %s2780_s0 = smov 64  }
  0x2e   :  { %2141 = vmatmul.mubr.msk.f32.vlgmr.msra.gmra.mrb[0].mxu0 %vm75_vm1, %v59_v11  ;;  %v2936_v43 = vpack.c.bf16 %v214_v41, %v213_v40  ;;  %v215_v45 = vld [vmem:[%s3283_s4 + $0x30] sm:$0xff]  ;;  %v216_v46 = vld [vmem:[%s3283_s4 + $0x38] sm:$0xff]  ;;  %v2996_v60 = vld [vmem:[%s3284_s5] ss:$0 sm:$0xff]  ;;  %s2781_s5 = smov 96  }
  0x2f   :  { %2412 = vmatpush3.bf16.msra.mxu1 %v2865_v12  ;;  %2143 = vmatprep.mubr.msk.f32.mxu0 %vm75_vm1, %v60_v32  ;;  %v2952_v48 = vpack.c.bf16 %v216_v46, %v215_v45 }
  0x30   :  { %2425 = vmatprep.subr.bf16.mxu1 %v2776_v0  ;;  %2415 = vmatpush3.bf16.msra.mxu0 %v2901_v33 }
  0x31   :  { %2416 = vmatprep.subr.bf16.mxu0 %v2776_v0 }
  0x32   :  { %2161 = vmatmul.mubr.f32.vlgmr.msra.gmra.mrb[0].mxu1 %v2778_v1  ;;  %2144 = vmatmul.mubr.msk.f32.gmra.mrb[2].mxu0 %vm75_vm1, %v61_v34 }
  0x33   :  { %2427 = vmatpush3.bf16.msra.mxu1 %v2858_v8  ;;  %2190 = vmatprep.mubr.msk.f32.mxu1 %vm2777_vm0, %v2778_v1 }
  0x34   :  { %2428 = vmatprep.subr.bf16.mxu1 %v2776_v0  ;;  %2146 = vmatprep.mubr.msk.f32.mxu0 %vm75_vm1, %v62_v37 }
  0x35   :  { %2418 = vmatpush3.bf16.msra.mxu0 %v2918_v38 }
  0x36   :  { %2147 = vmatmul.mubr.msk.f32.gmra.mrb[4].mxu0 %vm75_vm1, %v63_v39  ;;  %2419 = vmatprep.subr.bf16.mxu0 %v2776_v0 }
  0x37   :  { %2430 = vmatpush3.bf16.msra.mxu1 %v2865_v12  ;;  %2149 = vmatprep.mubr.msk.f32.mxu0 %vm75_vm1, %v64_v42 }
  0x38   :  { %2431 = vmatprep.subr.bf16.mxu1 %v2776_v0 }
  0x39   :  { %2421 = vmatpush3.bf16.msra.mxu0 %v2936_v43 }
  0x3a   :  { %2150 = vmatmul.mubr.msk.f32.gmra.mrb[6].mxu0 %vm75_vm1, %v65_v44  ;;  %2422 = vmatprep.subr.bf16.mxu0 %v2776_v0 }
  0x3b   :  { %2179 = vmatprep.mubr.msk.f32.mxu0 %vm2777_vm0, %v2778_v1 }
  0x3d   :  { %2424 = vmatpush3.bf16.msra.mxu0 %v2952_v48 }
  0x3e   :  { %2443 = vmatprep.subr.bf16.mxu0 %v2776_v0 }
 0x101   :  { %v2884_v14 = vpop.f32.mrb[0].mxu0 }
 0x102   :  { %v166_v15 = vpop.f32.mrb[1].mxu0  ;;  %v172_v59 = vadd.f32 %v2884_v14, %v2882_v13 }
 0x103   :  { %v167_v16 = vadd.f32 %v2882_v13, %v166_v15 }
 0x105   :  { %v294_v17 = vpop.f32.mrb[0].mxu1  ;;  %v2960_v51 = vpop.f32.mrb[2].mxu0 }
 0x106   :  { %v298_v18 = vadd.f32 %v294_v17, %v167_v16  ;;  %v2162_v19 = vpop.f32.mrb[1].mxu1  ;;  %v2962_v52 = vpop.f32.mrb[3].mxu0 }
 0x107   :  { %v177_v39 = vadd.f32 %v2882_v13, %v2962_v52 }
 0x108   :  { %2568 = vtanh.f32 %v298_v18  ;;  %v1975_v21 = vmul.f32 -1.442695, %v298_v18 }
 0x109   :  { %v2964_v53 = vpop.f32.mrb[4].mxu0 }
 0x10a   :  { %2570 = vpow2.f32 %v1975_v21  ;;  %v2966_v54 = vpop.f32.mrb[5].mxu0 }
 0x10d   :  { %v2968_v55 = vpop.f32.mrb[6].mxu0 }
 0x10e   :  { %v2970_v56 = vpop.f32.mrb[7].mxu0 }
 0x112   :  { %v2569_v20 = vpop.eup %2568 }
 0x113   :  { %308 = vrot.lane.b32.xlu0 %v2569_v20, %s2779_s13 }
 0x114   :  { %v2571_v22 = vpop.eup %2570 }
 0x115   :  { %v302_v23 = vadd.f32 1.0, %v2571_v22 }
 0x117   :  { %2572 = vrcp.f32 %v302_v23 }
 0x121   :  { %v2573_v24 = vpop.eup %2572 }
 0x122   :  { %v306_v27 = vmul.f32 0.0, %v2573_v24 }
 0x185   :  { %v309_v25 = vpop.permute.xlu0 %308 }
 0x186   :  { %v311_v26 = vmul.f32 %v2573_v24, %v309_v25 }
 0x188   :  { %313 = vrot.lane.b32.xlu0 %v311_v26, %s2779_s13 }
 0x1fa   :  { %v314_v28 = vpop.permute.xlu0 %313 }
 0x1fb   :  { %v2889_v29 = vadd.f32 %v314_v28, %v306_v27 }
 0x1fd   :  { %2574 = vtanh.f32 %v2889_v29 }
 0x207   :  { %v2575_v47 = vpop.eup %2574 }
 0x208   :  { %319 = vrot.lane.b32.xlu1 %v2575_v47, %s2779_s13 }
 0x27a   :  { %v320_v49 = vpop.permute.xlu1 %319 }
 0x27b   :  { %v322_v50 = vmul.f32 %v2573_v24, %v320_v49 }
 0x27d   :  { %324 = vrot.lane.b32.xlu1 %v322_v50, %s2780_s0 }
 0x2ef   :  { %v325_v57 = vpop.permute.xlu1 %324 }
 0x2f0   :  { %v327_v58 = vsel %vm224_vm2, %v325_v57, 0.0  ;;  %2191 = vmatmul.mubr.msk.f32.vlgmr.msra.gmra.mrb[2].mxu1 %vm224_vm2, %v325_v57 }
 0x2f1   :  { %2180 = vmatmul.mubr.msk.f32.vlgmr.msra.gmra.mrb[8].mxu0 %vm328_vm3, %v327_v58  ;;  %2433 = vmatpush3.bf16.msra.mxu1 %v2901_v33 }
 0x2f2   :  { %2434 = vmatprep.subr.bf16.mxu1 %v2776_v0  ;;  %2445 = vmatpush3.bf16.msra.mxu0 %v2858_v8 }
 0x2f3   :  { %2446 = vmatprep.subr.bf16.mxu0 %v2776_v0  ;;  %2220 = vmatprep.mubr.msk.f32.mxu0 %vm2777_vm0, %v2778_v1 }
 0x2f4   :  { %2209 = vmatprep.mubr.msk.f32.mxu1 %vm2777_vm0, %v2778_v1 }
 0x2f5   :  { %2436 = vmatpush3.bf16.msra.mxu1 %v2918_v38 }
 0x2f6   :  { %2437 = vmatprep.subr.bf16.mxu1 %v2776_v0  ;;  %2448 = vmatpush3.bf16.msra.mxu0 %v2865_v12 }
 0x2f7   :  { %2449 = vmatprep.subr.bf16.mxu0 %v2776_v0 }
 0x2f9   :  { %2439 = vmatpush3.bf16.msra.mxu1 %v2936_v43 }
 0x2fa   :  { %2440 = vmatprep.subr.bf16.mxu1 %v2776_v0 }
 0x2fd   :  { %2442 = vmatpush3.bf16.msra.mxu1 %v2952_v48 }
 0x2fe   :  { %2461 = vmatprep.subr.bf16.mxu1 %v2776_v0 }
 0x3c3   :  { %v495_v61 = vpop.f32.mrb[2].mxu1 }
 0x3c4   :  { %v499_v62 = vadd.f32 %v495_v61, %v172_v59  ;;  %v398_v63 = vpop.f32.mrb[8].mxu0  ;;  %v2192_v2 = vpop.f32.mrb[3].mxu1 }
 0x3c5   :  { %v399_v3 = vadd.f32 %v2996_v60, %v398_v63  ;;  %v2181_v4 = vpop.f32.mrb[9].mxu0 }
 0x3c6   :  { %2576 = vtanh.f32 %v499_v62  ;;  %v1979_v7 = vmul.f32 -1.442695, %v499_v62 }
 0x3c7   :  { %2578 = vtanh.f32 %v399_v3  ;;  %v1977_v9 = vmul.f32 -1.442695, %v399_v3 }
 0x3c8   :  { %2580 = vpow2.f32 %v1979_v7 }
 0x3c9   :  { %2582 = vpow2.f32 %v1977_v9 }
 0x3d0   :  { %v2577_v5 = vpop.eup %2576 }
 0x3d1   :  { %v2579_v6 = vpop.eup %2578  ;;  %509 = vrot.lane.b32.xlu1 %v2577_v5, %s2779_s13 }
 0x3d2   :  { %411 = vrot.lane.b32.xlu0 %v2579_v6, %s2779_s13  ;;  %v2581_v10 = vpop.eup %2580 }
 0x3d3   :  { %v2583_v11 = vpop.eup %2582  ;;  %v503_v14 = vadd.f32 1.0, %v2581_v10 }
 0x3d4   :  { %v405_v15 = vadd.f32 1.0, %v2583_v11 }
 0x3d5   :  { %2584 = vrcp.f32 %v503_v14 }
 0x3d6   :  { %2586 = vrcp.f32 %v405_v15 }
 0x3df   :  { %v2585_v16 = vpop.eup %2584 }
 0x3e0   :  { %v2587_v18 = vpop.eup %2586  ;;  %v507_v22 = vmul.f32 %v2585_v16, %v2889_v29 }
 0x3e1   :  { %v409_v24 = vmul.f32 0.0, %v2587_v18 }
 0x443   :  { %v510_v17 = vpop.permute.xlu1 %509 }
 0x444   :  { %v512_v19 = vmul.f32 %v2585_v16, %v510_v17  ;;  %v412_v20 = vpop.permute.xlu0 %411 }
 0x445   :  { %v414_v21 = vmul.f32 %v2587_v18, %v412_v20 }
 0x446   :  { %514 = vrot.lane.b32.xlu1 %v512_v19, %s2779_s13 }
 0x447   :  { %416 = vrot.lane.b32.xlu0 %v414_v21, %s2779_s13 }
 0x4b8   :  { %v515_v23 = vpop.permute.xlu1 %514 }
 0x4b9   :  { %v3004_v25 = vadd.f32 %v515_v23, %v507_v22  ;;  %v417_v26 = vpop.permute.xlu0 %416 }
 0x4ba   :  { %v3006_v27 = vadd.f32 %v417_v26, %v409_v24  ;;  %v182_v24 = vadd.f32 %v2960_v51, %v2882_v13 }
 0x4bb   :  { %2588 = vtanh.f32 %v3004_v25 }
 0x4bc   :  { %2590 = vtanh.f32 %v3006_v27 }
 0x4c5   :  { %v2589_v28 = vpop.eup %2588 }
 0x4c6   :  { %v2591_v30 = vpop.eup %2590  ;;  %520 = vrot.lane.b32.xlu1 %v2589_v28, %s2779_s13 }
 0x4c7   :  { %422 = vrot.lane.b32.xlu0 %v2591_v30, %s2779_s13 }
 0x538   :  { %v521_v31 = vpop.permute.xlu1 %520 }
 0x539   :  { %v523_v32 = vmul.f32 %v2585_v16, %v521_v31  ;;  %v423_v29 = vpop.permute.xlu0 %422 }
 0x53a   :  { %v3012_v34 = vmul.f32 %v2587_v18, %v423_v29 }
 0x53b   :  { %525 = vrot.lane.b32.xlu0 %v523_v32, %s2780_s0 }
 0x53c   :  { %529 = vrot.lane.b32.xlu1 %v3012_v34, %s2781_s5 }
 0x5ad   :  { %v526_v35 = vpop.permute.xlu0 %525 }
 0x5ae   :  { %v530_v36 = vpop.permute.xlu1 %529  ;;  %2221 = vmatmul.mubr.msk.f32.vlgmr.msra.gmra.mrb[10].mxu0 %vm224_vm2, %v526_v35 }
 0x5af   :  { %v532_v37 = vsel %vm224_vm2, %v526_v35, %v530_v36  ;;  %2451 = vmatpush3.bf16.msra.mxu0 %v2901_v33  ;;  %2239 = vmatprep.mubr.msk.f32.mxu0 %vm2777_vm0, %v2778_v1 }
 0x5b0   :  { %2210 = vmatmul.mubr.msk.f32.vlgmr.msra.gmra.mrb[4].mxu1 %vm328_vm3, %v532_v37  ;;  %2452 = vmatprep.subr.bf16.mxu0 %v2776_v0 }
 0x5b1   :  { %2463 = vmatpush3.bf16.msra.mxu1 %v2858_v8  ;;  %2250 = vmatprep.mubr.msk.f32.mxu1 %vm2777_vm0, %v2778_v1 }
 0x5b2   :  { %2464 = vmatprep.subr.bf16.mxu1 %v2776_v0 }
 0x5b3   :  { %2454 = vmatpush3.bf16.msra.mxu0 %v2918_v38 }
 0x5b4   :  { %2455 = vmatprep.subr.bf16.mxu0 %v2776_v0 }
 0x5b5   :  { %2466 = vmatpush3.bf16.msra.mxu1 %v2865_v12 }
 0x5b6   :  { %2467 = vmatprep.subr.bf16.mxu1 %v2776_v0 }
 0x5b7   :  { %2457 = vmatpush3.bf16.msra.mxu0 %v2936_v43 }
 0x5b8   :  { %2458 = vmatprep.subr.bf16.mxu0 %v2776_v0 }
 0x5bb   :  { %2460 = vmatpush3.bf16.msra.mxu0 %v2952_v48 }
 0x5bc   :  { %2479 = vmatprep.subr.bf16.mxu0 %v2776_v0 }
 0x681   :  { %v699_v40 = vpop.f32.mrb[10].mxu0 }
 0x682   :  { %v703_v41 = vadd.f32 %v699_v40, %v177_v39  ;;  %v2222_v42 = vpop.f32.mrb[11].mxu0 }
 0x683   :  { %v602_v44 = vpop.f32.mrb[4].mxu1 }
 0x684   :  { %2592 = vtanh.f32 %v703_v41  ;;  %v603_v45 = vadd.f32 %v2996_v60, %v602_v44  ;;  %v2211_v46 = vpop.f32.mrb[5].mxu1  ;;  %v1983_v50 = vmul.f32 -1.442695, %v703_v41 }
 0x686   :  { %2594 = vtanh.f32 %v603_v45  ;;  %v1981_v57 = vmul.f32 -1.442695, %v603_v45 }
 0x687   :  { %2596 = vpow2.f32 %v1983_v50 }
 0x688   :  { %2598 = vpow2.f32 %v1981_v57 }
 0x68e   :  { %v2593_v47 = vpop.eup %2592 }
 0x68f   :  { %713 = vrot.lane.b32.xlu1 %v2593_v47, %s2779_s13 }
 0x690   :  { %v2595_v49 = vpop.eup %2594 }
 0x691   :  { %615 = vrot.lane.b32.xlu0 %v2595_v49, %s2779_s13  ;;  %v2597_v52 = vpop.eup %2596 }
 0x692   :  { %v2599_v58 = vpop.eup %2598  ;;  %v707_v59 = vadd.f32 1.0, %v2597_v52 }
 0x693   :  { %v609_v61 = vadd.f32 1.0, %v2599_v58 }
 0x694   :  { %2600 = vrcp.f32 %v707_v59 }
 0x695   :  { %2602 = vrcp.f32 %v609_v61 }
 0x69e   :  { %v2601_v62 = vpop.eup %2600 }
 0x69f   :  { %v2603_v3 = vpop.eup %2602  ;;  %v711_v6 = vmul.f32 %v2601_v62, %v3004_v25 }
 0x6a0   :  { %v613_v10 = vmul.f32 %v2603_v3, %v3006_v27 }
 0x701   :  { %v714_v63 = vpop.permute.xlu1 %713 }
 0x702   :  { %v716_v2 = vmul.f32 %v2601_v62, %v714_v63 }
 0x703   :  { %v616_v4 = vpop.permute.xlu0 %615 }
 0x704   :  { %718 = vrot.lane.b32.xlu1 %v716_v2, %s2779_s13  ;;  %v618_v5 = vmul.f32 %v2603_v3, %v616_v4 }
 0x706   :  { %620 = vrot.lane.b32.xlu0 %v618_v5, %s2779_s13 }
 0x776   :  { %v719_v7 = vpop.permute.xlu1 %718 }
 0x777   :  { %v3044_v9 = vadd.f32 %v719_v7, %v711_v6 }
 0x778   :  { %v621_v11 = vpop.permute.xlu0 %620 }
 0x779   :  { %2604 = vtanh.f32 %v3044_v9  ;;  %v3048_v14 = vadd.f32 %v621_v11, %v613_v10 }
 0x77b   :  { %2606 = vtanh.f32 %v3048_v14 }
 0x783   :  { %v2605_v15 = vpop.eup %2604 }
 0x784   :  { %724 = vrot.lane.b32.xlu1 %v2605_v15, %s2779_s13 }
 0x785   :  { %v2607_v16 = vpop.eup %2606 }
 0x786   :  { %626 = vrot.lane.b32.xlu0 %v2607_v16, %s2779_s13 }
 0x7f6   :  { %v725_v17 = vpop.permute.xlu1 %724 }
 0x7f7   :  { %v727_v18 = vmul.f32 %v2601_v62, %v725_v17 }
 0x7f8   :  { %v627_v19 = vpop.permute.xlu0 %626 }
 0x7f9   :  { %729 = vrot.lane.b32.xlu0 %v727_v18, %s2780_s0  ;;  %v3054_v20 = vmul.f32 %v2603_v3, %v627_v19 }
 0x7fb   :  { %733 = vrot.lane.b32.xlu1 %v3054_v20, %s2781_s5  ;;  %v630_v4 = vadd.f32 %v3054_v20, %v3012_v34  ;;  %v187_v34 = vadd.f32 %v2882_v13, %v2966_v54 }
 0x86b   :  { %v730_v21 = vpop.permute.xlu0 %729 }
 0x86c   :  { %2251 = vmatmul.mubr.msk.f32.vlgmr.msra.gmra.mrb[6].mxu1 %vm224_vm2, %v730_v21 }
 0x86d   :  { %2469 = vmatpush3.bf16.msra.mxu1 %v2901_v33  ;;  %2269 = vmatprep.mubr.msk.f32.mxu1 %vm2777_vm0, %v2778_v1  ;;  %v734_v22 = vpop.permute.xlu1 %733 }
 0x86e   :  { %2470 = vmatprep.subr.bf16.mxu1 %v2776_v0  ;;  %v736_v23 = vsel %vm224_vm2, %v730_v21, %v734_v22 }
 0x86f   :  { %2240 = vmatmul.mubr.msk.f32.vlgmr.msra.gmra.mrb[12].mxu0 %vm328_vm3, %v736_v23 }
 0x870   :  { %2481 = vmatpush3.bf16.msra.mxu0 %v2858_v8  ;;  %2280 = vmatprep.mubr.msk.f32.mxu0 %vm2777_vm0, %v2778_v1 }
 0x871   :  { %2472 = vmatpush3.bf16.msra.mxu1 %v2918_v38  ;;  %2482 = vmatprep.subr.bf16.mxu0 %v2776_v0 }
 0x872   :  { %2473 = vmatprep.subr.bf16.mxu1 %v2776_v0 }
 0x874   :  { %2484 = vmatpush3.bf16.msra.mxu0 %v2865_v12 }
 0x875   :  { %2475 = vmatpush3.bf16.msra.mxu1 %v2936_v43  ;;  %2485 = vmatprep.subr.bf16.mxu0 %v2776_v0 }
 0x876   :  { %2476 = vmatprep.subr.bf16.mxu1 %v2776_v0 }
 0x879   :  { %2478 = vmatpush3.bf16.msra.mxu1 %v2952_v48 }
 0x87a   :  { %2497 = vmatprep.subr.bf16.mxu1 %v2776_v0 }
 0x93f   :  { %v903_v25 = vpop.f32.mrb[6].mxu1 }
 0x940   :  { %v907_v26 = vadd.f32 %v903_v25, %v182_v24  ;;  %v2252_v27 = vpop.f32.mrb[7].mxu1 }
 0x942   :  { %2608 = vtanh.f32 %v907_v26  ;;  %v806_v28 = vpop.f32.mrb[12].mxu0  ;;  %v1987_v35 = vmul.f32 -1.442695, %v907_v26 }
 0x943   :  { %v807_v30 = vadd.f32 %v2996_v60, %v806_v28  ;;  %v2241_v31 = vpop.f32.mrb[13].mxu0 }
 0x945   :  { %2610 = vtanh.f32 %v807_v30  ;;  %v1985_v36 = vmul.f32 -1.442695, %v807_v30 }
 0x946   :  { %2612 = vpow2.f32 %v1987_v35 }
 0x947   :  { %2614 = vpow2.f32 %v1985_v36 }
 0x94c   :  { %v2609_v32 = vpop.eup %2608 }
 0x94d   :  { %917 = vrot.lane.b32.xlu1 %v2609_v32, %s2779_s13 }
 0x94f   :  { %v2611_v29 = vpop.eup %2610 }
 0x950   :  { %819 = vrot.lane.b32.xlu0 %v2611_v29, %s2779_s13  ;;  %v2613_v51 = vpop.eup %2612 }
 0x951   :  { %v911_v37 = vadd.f32 1.0, %v2613_v51  ;;  %v2615_v39 = vpop.eup %2614 }
 0x952   :  { %v813_v40 = vadd.f32 1.0, %v2615_v39 }
 0x953   :  { %2616 = vrcp.f32 %v911_v37 }
 0x954   :  { %2618 = vrcp.f32 %v813_v40 }
 0x95d   :  { %v2617_v41 = vpop.eup %2616 }
 0x95e   :  { %v2619_v45 = vpop.eup %2618  ;;  %v915_v49 = vmul.f32 %v2617_v41, %v3044_v9 }
 0x95f   :  { %v817_v52 = vmul.f32 %v2619_v45, %v3048_v14 }
 0x9bf   :  { %v918_v42 = vpop.permute.xlu1 %917 }
 0x9c0   :  { %v920_v44 = vmul.f32 %v2617_v41, %v918_v42 }
 0x9c2   :  { %922 = vrot.lane.b32.xlu1 %v920_v44, %s2779_s13  ;;  %v820_v46 = vpop.permute.xlu0 %819 }
 0x9c3   :  { %v822_v47 = vmul.f32 %v2619_v45, %v820_v46 }
 0x9c5   :  { %824 = vrot.lane.b32.xlu0 %v822_v47, %s2779_s13 }
 0xa34   :  { %v923_v50 = vpop.permute.xlu1 %922 }
 0xa35   :  { %v3085_v57 = vadd.f32 %v923_v50, %v915_v49 }
 0xa37   :  { %2620 = vtanh.f32 %v3085_v57  ;;  %v825_v58 = vpop.permute.xlu0 %824 }
 0xa38   :  { %v3089_v59 = vadd.f32 %v825_v58, %v817_v52  ;;  %v192_v52 = vadd.f32 %v2964_v53, %v2882_v13 }
 0xa3a   :  { %2622 = vtanh.f32 %v3089_v59 }
 0xa41   :  { %v2621_v61 = vpop.eup %2620 }
 0xa42   :  { %928 = vrot.lane.b32.xlu1 %v2621_v61, %s2779_s13 }
 0xa44   :  { %v2623_v62 = vpop.eup %2622 }
 0xa45   :  { %830 = vrot.lane.b32.xlu0 %v2623_v62, %s2779_s13 }
 0xab4   :  { %v929_v63 = vpop.permute.xlu1 %928 }
 0xab5   :  { %v931_v2 = vmul.f32 %v2617_v41, %v929_v63 }
 0xab7   :  { %933 = vrot.lane.b32.xlu0 %v931_v2, %s2780_s0  ;;  %v831_v3 = vpop.permute.xlu0 %830 }
 0xab8   :  { %v833_v5 = vmul.f32 %v2619_v45, %v831_v3 }
 0xaba   :  { %v3097_v6 = vadd.f32 %v833_v5, %v630_v4  ;;  %937 = vrot.lane.b32.xlu1 %v833_v5, %s2781_s5 }
 0xb29   :  { %v934_v7 = vpop.permute.xlu0 %933 }
 0xb2a   :  { %2281 = vmatmul.mubr.msk.f32.vlgmr.msra.gmra.mrb[14].mxu0 %vm224_vm2, %v934_v7 }
 0xb2b   :  { %2487 = vmatpush3.bf16.msra.mxu0 %v2901_v33  ;;  %2299 = vmatprep.mubr.msk.f32.mxu0 %vm2777_vm0, %v2778_v1 }
 0xb2c   :  { %2488 = vmatprep.subr.bf16.mxu0 %v2776_v0  ;;  %v938_v9 = vpop.permute.xlu1 %937 }
 0xb2d   :  { %v940_v10 = vsel %vm224_vm2, %v934_v7, %v938_v9 }
 0xb2e   :  { %2270 = vmatmul.mubr.msk.f32.vlgmr.msra.gmra.mrb[8].mxu1 %vm328_vm3, %v940_v10 }
 0xb2f   :  { %2490 = vmatpush3.bf16.msra.mxu0 %v2918_v38  ;;  %2499 = vmatpush3.bf16.msra.mxu1 %v2858_v8 }
 0xb30   :  { %2491 = vmatprep.subr.bf16.mxu0 %v2776_v0  ;;  %2500 = vmatprep.subr.bf16.mxu1 %v2776_v0 }
 0xb31   :  { %2310 = vmatprep.mubr.msk.f32.mxu1 %vm2777_vm0, %v2778_v1 }
 0xb33   :  { %2493 = vmatpush3.bf16.msra.mxu0 %v2936_v43  ;;  %2502 = vmatpush3.bf16.msra.mxu1 %v2865_v12 }
 0xb34   :  { %2494 = vmatprep.subr.bf16.mxu0 %v2776_v0  ;;  %2503 = vmatprep.subr.bf16.mxu1 %v2776_v0 }
 0xb37   :  { %2496 = vmatpush3.bf16.msra.mxu0 %v2952_v48 }
 0xb38   :  { %2515 = vmatprep.subr.bf16.mxu0 %v2776_v0 }
 0xbfd   :  { %v1107_v11 = vpop.f32.mrb[14].mxu0 }
 0xbfe   :  { %v1111_v14 = vadd.f32 %v1107_v11, %v187_v34  ;;  %v2282_v15 = vpop.f32.mrb[15].mxu0 }
 0xc00   :  { %2624 = vtanh.f32 %v1111_v14  ;;  %v1991_v21 = vmul.f32 -1.442695, %v1111_v14 }
 0xc01   :  { %v1010_v16 = vpop.f32.mrb[8].mxu1 }
 0xc02   :  { %v1011_v17 = vadd.f32 %v2996_v60, %v1010_v16  ;;  %v2271_v18 = vpop.f32.mrb[9].mxu1 }
 0xc04   :  { %2626 = vtanh.f32 %v1011_v17  ;;  %v1989_v22 = vmul.f32 -1.442695, %v1011_v17 }
 0xc05   :  { %2628 = vpow2.f32 %v1991_v21 }
 0xc06   :  { %2630 = vpow2.f32 %v1989_v22 }
 0xc0a   :  { %v2625_v19 = vpop.eup %2624 }
 0xc0b   :  { %1121 = vrot.lane.b32.xlu1 %v2625_v19, %s2779_s13 }
 0xc0e   :  { %v2627_v20 = vpop.eup %2626 }
 0xc0f   :  { %1023 = vrot.lane.b32.xlu0 %v2627_v20, %s2779_s13  ;;  %v2629_v54 = vpop.eup %2628 }
 0xc10   :  { %v1115_v23 = vadd.f32 1.0, %v2629_v54  ;;  %v2631_v24 = vpop.eup %2630 }
 0xc11   :  { %v1017_v25 = vadd.f32 1.0, %v2631_v24 }
 0xc12   :  { %2632 = vrcp.f32 %v1115_v23 }
 0xc13   :  { %2634 = vrcp.f32 %v1017_v25 }
 0xc1c   :  { %v2633_v26 = vpop.eup %2632 }
 0xc1d   :  { %v2635_v30 = vpop.eup %2634  ;;  %v1119_v29 = vmul.f32 %v2633_v26, %v3085_v57 }
 0xc1e   :  { %v1021_v51 = vmul.f32 %v2635_v30, %v3089_v59 }
 0xc7d   :  { %v1122_v27 = vpop.permute.xlu1 %1121 }
 0xc7e   :  { %v1124_v28 = vmul.f32 %v2633_v26, %v1122_v27 }
 0xc80   :  { %1126 = vrot.lane.b32.xlu1 %v1124_v28, %s2779_s13 }
 0xc81   :  { %v1024_v31 = vpop.permute.xlu0 %1023 }
 0xc82   :  { %v1026_v32 = vmul.f32 %v2635_v30, %v1024_v31 }
 0xc84   :  { %1028 = vrot.lane.b32.xlu0 %v1026_v32, %s2779_s13 }
 0xcf2   :  { %v1127_v35 = vpop.permute.xlu1 %1126 }
 0xcf3   :  { %v3127_v36 = vadd.f32 %v1127_v35, %v1119_v29 }
 0xcf5   :  { %2636 = vtanh.f32 %v3127_v36 }
 0xcf6   :  { %v1029_v37 = vpop.permute.xlu0 %1028 }
 0xcf7   :  { %v3131_v39 = vadd.f32 %v1029_v37, %v1021_v51 }
 0xcf9   :  { %2638 = vtanh.f32 %v3131_v39 }
 0xcff   :  { %v2637_v40 = vpop.eup %2636 }
 0xd00   :  { %1132 = vrot.lane.b32.xlu1 %v2637_v40, %s2779_s13 }
 0xd03   :  { %v2639_v41 = vpop.eup %2638 }
 0xd04   :  { %1034 = vrot.lane.b32.xlu0 %v2639_v41, %s2779_s13 }
 0xd72   :  { %v1133_v42 = vpop.permute.xlu1 %1132 }
 0xd73   :  { %v1135_v44 = vmul.f32 %v2633_v26, %v1133_v42 }
 0xd75   :  { %1137 = vrot.lane.b32.xlu0 %v1135_v44, %s2780_s0 }
 0xd76   :  { %v1035_v45 = vpop.permute.xlu0 %1034 }
 0xd77   :  { %v1037_v46 = vmul.f32 %v2635_v30, %v1035_v45 }
 0xd79   :  { %v3138_v47 = vadd.f32 %v1037_v46, %v3097_v6  ;;  %1141 = vrot.lane.b32.xlu1 %v1037_v46, %s2781_s5 }
 0xde7   :  { %v1138_v49 = vpop.permute.xlu0 %1137 }
 0xde8   :  { %2311 = vmatmul.mubr.msk.f32.vlgmr.msra.gmra.mrb[10].mxu1 %vm224_vm2, %v1138_v49 }
 0xde9   :  { %2505 = vmatpush3.bf16.msra.mxu1 %v2901_v33  ;;  %2329 = vmatprep.mubr.msk.f32.mxu1 %vm2777_vm0, %v2778_v1 }
 0xdea   :  { %2506 = vmatprep.subr.bf16.mxu1 %v2776_v0 }
 0xdeb   :  { %v1142_v50 = vpop.permute.xlu1 %1141 }
 0xdec   :  { %v1144_v57 = vsel %vm224_vm2, %v1138_v49, %v1142_v50 }
 0xded   :  { %2508 = vmatpush3.bf16.msra.mxu1 %v2918_v38  ;;  %2300 = vmatmul.mubr.msk.f32.vlgmr.msra.gmra.mrb[16].mxu0 %vm328_vm3, %v1144_v57 }
 0xdee   :  { %2509 = vmatprep.subr.bf16.mxu1 %v2776_v0  ;;  %2517 = vmatpush3.bf16.msra.mxu0 %v2858_v8 }
 0xdef   :  { %2340 = vmatprep.mubr.msk.f32.mxu0 %vm2777_vm0, %v2778_v1  ;;  %2518 = vmatprep.subr.bf16.mxu0 %v2776_v0 }
 0xdf1   :  { %2511 = vmatpush3.bf16.msra.mxu1 %v2936_v43 }
 0xdf2   :  { %2512 = vmatprep.subr.bf16.mxu1 %v2776_v0  ;;  %2520 = vmatpush3.bf16.msra.mxu0 %v2865_v12 }
 0xdf3   :  { %2521 = vmatprep.subr.bf16.mxu0 %v2776_v0 }
 0xdf5   :  { %2514 = vmatpush3.bf16.msra.mxu1 %v2952_v48 }
 0xdf6   :  { %2533 = vmatprep.subr.bf16.mxu1 %v2776_v0 }
 0xebb   :  { %v1311_v58 = vpop.f32.mrb[10].mxu1 }
 0xebc   :  { %v1315_v59 = vadd.f32 %v1311_v58, %v192_v52  ;;  %v2312_v61 = vpop.f32.mrb[11].mxu1 }
 0xebe   :  { %2640 = vtanh.f32 %v1315_v59  ;;  %v1995_v5 = vmul.f32 -1.442695, %v1315_v59 }
 0xec0   :  { %v1214_v62 = vpop.f32.mrb[16].mxu0 }
 0xec1   :  { %v1215_v63 = vadd.f32 %v2996_v60, %v1214_v62  ;;  %v2301_v2 = vpop.f32.mrb[17].mxu0 }
 0xec3   :  { %2642 = vtanh.f32 %v1215_v63  ;;  %v1993_v6 = vmul.f32 -1.442695, %v1215_v63 }
 0xec4   :  { %2644 = vpow2.f32 %v1995_v5 }
 0xec5   :  { %2646 = vpow2.f32 %v1993_v6 }
 0xec8   :  { %v2641_v3 = vpop.eup %2640 }
 0xec9   :  { %1325 = vrot.lane.b32.xlu1 %v2641_v3, %s2779_s13 }
 0xecd   :  { %v2643_v4 = vpop.eup %2642 }
 0xece   :  { %1227 = vrot.lane.b32.xlu0 %v2643_v4, %s2779_s13  ;;  %v2645_v53 = vpop.eup %2644 }
 0xecf   :  { %v1319_v7 = vadd.f32 1.0, %v2645_v53  ;;  %v2647_v9 = vpop.eup %2646 }
 0xed0   :  { %v1221_v10 = vadd.f32 1.0, %v2647_v9 }
 0xed1   :  { %2648 = vrcp.f32 %v1319_v7 }
 0xed2   :  { %2650 = vrcp.f32 %v1221_v10 }
 0xedb   :  { %v2649_v34 = vpop.eup %2648 }
 0xedc   :  { %v2651_v15 = vpop.eup %2650  ;;  %v1323_v18 = vmul.f32 %v2649_v34, %v3127_v36 }
 0xedd   :  { %v1225_v21 = vmul.f32 %v2651_v15, %v3131_v39 }
 0xf3b   :  { %v1326_v11 = vpop.permute.xlu1 %1325 }
 0xf3c   :  { %v1328_v14 = vmul.f32 %v2649_v34, %v1326_v11 }
 0xf3e   :  { %1330 = vrot.lane.b32.xlu1 %v1328_v14, %s2779_s13 }
 0xf40   :  { %v1228_v16 = vpop.permute.xlu0 %1227 }
 0xf41   :  { %v1230_v17 = vmul.f32 %v2651_v15, %v1228_v16 }
 0xf43   :  { %1232 = vrot.lane.b32.xlu0 %v1230_v17, %s2779_s13 }
 0xfb0   :  { %v1331_v19 = vpop.permute.xlu1 %1330 }
 0xfb1   :  { %v3168_v20 = vadd.f32 %v1331_v19, %v1323_v18 }
 0xfb3   :  { %2652 = vtanh.f32 %v3168_v20 }
 0xfb5   :  { %v1233_v22 = vpop.permute.xlu0 %1232 }
 0xfb6   :  { %v3172_v54 = vadd.f32 %v1233_v22, %v1225_v21 }
 0xfb8   :  { %2654 = vtanh.f32 %v3172_v54 }
 0xfbd   :  { %v2653_v23 = vpop.eup %2652 }
 0xfbe   :  { %1336 = vrot.lane.b32.xlu1 %v2653_v23, %s2779_s13 }
 0xfc2   :  { %v2655_v24 = vpop.eup %2654 }
 0xfc3   :  { %1238 = vrot.lane.b32.xlu0 %v2655_v24, %s2779_s13 }
0x1030   :  { %v1337_v25 = vpop.permute.xlu1 %1336 }
0x1031   :  { %v1339_v26 = vmul.f32 %v2649_v34, %v1337_v25 }
0x1033   :  { %1341 = vrot.lane.b32.xlu0 %v1339_v26, %s2780_s0 }
0x1035   :  { %v1239_v27 = vpop.permute.xlu0 %1238 }
0x1036   :  { %v1241_v28 = vmul.f32 %v2651_v15, %v1239_v27 }
0x1038   :  { %v3179_v30 = vadd.f32 %v1241_v28, %v3138_v47  ;;  %1345 = vrot.lane.b32.xlu1 %v1241_v28, %s2781_s5 }
0x10a5   :  { %v1342_v31 = vpop.permute.xlu0 %1341 }
0x10a6   :  { %2341 = vmatmul.mubr.msk.f32.vlgmr.msra.gmra.mrb[18].mxu0 %vm224_vm2, %v1342_v31 }
0x10a7   :  { %2523 = vmatpush3.bf16.msra.mxu0 %v2901_v33  ;;  %2359 = vmatprep.mubr.msk.f32.mxu0 %vm2777_vm0, %v2778_v1 }
0x10a8   :  { %2524 = vmatprep.subr.bf16.mxu0 %v2776_v0 }
0x10aa   :  { %v1346_v32 = vpop.permute.xlu1 %1345 }
0x10ab   :  { %2526 = vmatpush3.bf16.msra.mxu0 %v2918_v38  ;;  %v1348_v29 = vsel %vm224_vm2, %v1342_v31, %v1346_v32 }
0x10ac   :  { %2527 = vmatprep.subr.bf16.mxu0 %v2776_v0  ;;  %2330 = vmatmul.mubr.msk.f32.vlgmr.msra.gmra.mrb[12].mxu1 %vm328_vm3, %v1348_v29 }
0x10ad   :  { %2535 = vmatpush3.bf16.msra.mxu1 %v2858_v8  ;;  %2370 = vmatprep.mubr.msk.f32.mxu1 %vm2777_vm0, %v2778_v1  ;;  %v197_v8 = vadd.f32 %v2882_v13, %v2970_v56 }
0x10ae   :  { %2536 = vmatprep.subr.bf16.mxu1 %v2776_v0 }
0x10af   :  { %2529 = vmatpush3.bf16.msra.mxu0 %v2936_v43 }
0x10b0   :  { %2530 = vmatprep.subr.bf16.mxu0 %v2776_v0 }
0x10b1   :  { %2538 = vmatpush3.bf16.msra.mxu1 %v2865_v12 }
0x10b2   :  { %2539 = vmatprep.subr.bf16.mxu1 %v2776_v0 }
0x10b3   :  { %2532 = vmatpush3.bf16.msra.mxu0 %v2952_v48 }
0x10b4   :  { %2551 = vmatprep.subr.bf16.mxu0 %v2776_v0 }
0x1179   :  { %v1515_v35 = vpop.f32.mrb[18].mxu0 }
0x117a   :  { %v1519_v36 = vadd.f32 %v1515_v35, %v197_v8  ;;  %v2342_v51 = vpop.f32.mrb[19].mxu0 }
0x117c   :  { %2656 = vtanh.f32 %v1519_v36  ;;  %v1999_v42 = vmul.f32 -1.442695, %v1519_v36 }
0x117f   :  { %v1418_v37 = vpop.f32.mrb[12].mxu1 }
0x1180   :  { %v1419_v39 = vadd.f32 %v2996_v60, %v1418_v37  ;;  %v2331_v40 = vpop.f32.mrb[13].mxu1 }
0x1182   :  { %2658 = vtanh.f32 %v1419_v39  ;;  %v1997_v44 = vmul.f32 -1.442695, %v1419_v39 }
0x1183   :  { %2660 = vpow2.f32 %v1999_v42 }
0x1184   :  { %2662 = vpow2.f32 %v1997_v44 }
0x1186   :  { %v2657_v41 = vpop.eup %2656 }
0x1187   :  { %1529 = vrot.lane.b32.xlu1 %v2657_v41, %s2779_s13 }
0x118c   :  { %v2659_v12 = vpop.eup %2658 }
0x118d   :  { %1431 = vrot.lane.b32.xlu0 %v2659_v12, %s2779_s13  ;;  %v2661_v56 = vpop.eup %2660 }
0x118e   :  { %v1523_v45 = vadd.f32 1.0, %v2661_v56  ;;  %v2663_v46 = vpop.eup %2662 }
0x118f   :  { %v1425_v47 = vadd.f32 1.0, %v2663_v46 }
0x1190   :  { %2664 = vrcp.f32 %v1523_v45 }
0x1191   :  { %2666 = vrcp.f32 %v1425_v47 }
0x119a   :  { %v2665_v49 = vpop.eup %2664 }
0x119b   :  { %v2667_v52 = vpop.eup %2666  ;;  %v1527_v61 = vmul.f32 %v2665_v49, %v3168_v20 }
0x119c   :  { %v1429_v2 = vmul.f32 %v2667_v52, %v3172_v54 }
0x11f9   :  { %v1530_v50 = vpop.permute.xlu1 %1529 }
0x11fa   :  { %v1532_v57 = vmul.f32 %v2665_v49, %v1530_v50 }
0x11fc   :  { %1534 = vrot.lane.b32.xlu1 %v1532_v57, %s2779_s13 }
0x11ff   :  { %v1432_v58 = vpop.permute.xlu0 %1431 }
0x1200   :  { %v1434_v59 = vmul.f32 %v2667_v52, %v1432_v58 }
0x1202   :  { %1436 = vrot.lane.b32.xlu0 %v1434_v59, %s2779_s13 }
0x126e   :  { %v1535_v62 = vpop.permute.xlu1 %1534 }
0x126f   :  { %v1537_v63 = vadd.f32 %v1535_v62, %v1527_v61 }
0x1271   :  { %2668 = vtanh.f32 %v1537_v63 }
0x1274   :  { %v1437_v3 = vpop.permute.xlu0 %1436 }
0x1275   :  { %v1439_v4 = vadd.f32 %v1437_v3, %v1429_v2  ;;  %v1857_v3 = vld [vmem:[%s3285_s6 + $0x8] sm:$0xff] }
0x1277   :  { %2670 = vtanh.f32 %v1439_v4 }
0x127b   :  { %v2669_v5 = vpop.eup %2668 }
0x127c   :  { %1540 = vrot.lane.b32.xlu1 %v2669_v5, %s2779_s13 }
0x1281   :  { %v2671_v6 = vpop.eup %2670 }
0x1282   :  { %1442 = vrot.lane.b32.xlu0 %v2671_v6, %s2779_s13  ;;  %v1859_v6 = vld [vmem:[%s3285_s6 + $0x18] sm:$0xff] }
0x12ee   :  { %v1541_v53 = vpop.permute.xlu1 %1540 }
0x12ef   :  { %v1543_v7 = vmul.f32 %v2665_v49, %v1541_v53 }
0x12f1   :  { %1545 = vrot.lane.b32.xlu0 %v1543_v7, %s2780_s0 }
0x12f4   :  { %v1443_v9 = vpop.permute.xlu0 %1442 }
0x12f5   :  { %v1445_v10 = vmul.f32 %v2667_v52, %v1443_v9 }
0x12f7   :  { %v3214_v34 = vadd.f32 %v1445_v10, %v3179_v30  ;;  %1549 = vrot.lane.b32.xlu1 %v1445_v10, %s2781_s5 }
0x1363   :  { %v1546_v11 = vpop.permute.xlu0 %1545 }
0x1364   :  { %2371 = vmatmul.mubr.msk.f32.vlgmr.msra.gmra.mrb[14].mxu1 %vm224_vm2, %v1546_v11 }
0x1365   :  { %2541 = vmatpush3.bf16.msra.mxu1 %v2901_v33  ;;  %2389 = vmatprep.mubr.msk.f32.mxu1 %vm2777_vm0, %v2778_v1  ;;  %v202_v33 = vadd.f32 %v2968_v55, %v2882_v13 }
0x1366   :  { %2542 = vmatprep.subr.bf16.mxu1 %v2776_v0 }
0x1369   :  { %2544 = vmatpush3.bf16.msra.mxu1 %v2918_v38  ;;  %v1550_v14 = vpop.permute.xlu1 %1549 }
0x136a   :  { %2545 = vmatprep.subr.bf16.mxu1 %v2776_v0  ;;  %v1552_v15 = vsel %vm224_vm2, %v1546_v11, %v1550_v14 }
0x136b   :  { %2360 = vmatmul.mubr.msk.f32.vlgmr.msra.gmra.mrb[20].mxu0 %vm328_vm3, %v1552_v15  ;;  %v2006_v15 = vld [vmem:[%s3286_s7] ss:$0 sm:$0xff] }
0x136c   :  { %2400 = vmatprep.mubr.msk.f32.mxu0 %vm2777_vm0, %v2778_v1 }
0x136d   :  { %2547 = vmatpush3.bf16.msra.mxu1 %v2936_v43 }
0x136e   :  { %2548 = vmatprep.subr.bf16.mxu1 %v2776_v0 }
0x1371   :  { %2550 = vmatpush3.bf16.msra.mxu1 %v2952_v48 }
0x1437   :  { %v1719_v38 = vpop.f32.mrb[14].mxu1 }
0x1438   :  { %v1723_v16 = vadd.f32 %v1719_v38, %v202_v33  ;;  %v2372_v17 = vpop.f32.mrb[15].mxu1 }
0x143a   :  { %2672 = vtanh.f32 %v1723_v16  ;;  %v2003_v21 = vmul.f32 -1.442695, %v1723_v16 }
0x143e   :  { %v1622_v18 = vpop.f32.mrb[20].mxu0 }
0x143f   :  { %v1623_v19 = vadd.f32 %v2996_v60, %v1622_v18  ;;  %v2361_v20 = vpop.f32.mrb[21].mxu0 }
0x1441   :  { %2674 = vtanh.f32 %v1623_v19  ;;  %v2001_v48 = vmul.f32 -1.442695, %v1623_v19 }
0x1442   :  { %2676 = vpow2.f32 %v2003_v21 }
0x1443   :  { %2678 = vpow2.f32 %v2001_v48 }
0x1444   :  { %v2673_v43 = vpop.eup %2672 }
0x1445   :  { %1733 = vrot.lane.b32.xlu1 %v2673_v43, %s2779_s13 }
0x144b   :  { %v2675_v1 = vpop.eup %2674 }
0x144c   :  { %1635 = vrot.lane.b32.xlu0 %v2675_v1, %s2779_s13  ;;  %v2677_v13 = vpop.eup %2676 }
0x144d   :  { %v1727_v55 = vadd.f32 1.0, %v2677_v13  ;;  %v2679_v22 = vpop.eup %2678 }
0x144e   :  { %v1629_v54 = vadd.f32 1.0, %v2679_v22 }
0x144f   :  { %2680 = vrcp.f32 %v1727_v55 }
0x1450   :  { %2682 = vrcp.f32 %v1629_v54 }
0x1459   :  { %v2681_v23 = vpop.eup %2680 }
0x145a   :  { %v2683_v26 = vpop.eup %2682  ;;  %v1731_v30 = vmul.f32 %v2681_v23, %v1537_v63 }
0x145b   :  { %v1633_v29 = vmul.f32 %v2683_v26, %v1439_v4  ;;  %v1858_v4 = vld [vmem:[%s3285_s6 + $0x10] sm:$0xff] }
0x145c   :  { %v2555_v53 = vpack.c.bf16 %v1859_v6, %v1858_v4 }
0x14b7   :  { %v1734_v24 = vpop.permute.xlu1 %1733 }
0x14b8   :  { %v1736_v25 = vmul.f32 %v2681_v23, %v1734_v24 }
0x14ba   :  { %1738 = vrot.lane.b32.xlu1 %v1736_v25, %s2779_s13 }
0x14be   :  { %v1636_v27 = vpop.permute.xlu0 %1635 }
0x14bf   :  { %v1638_v28 = vmul.f32 %v2683_v26, %v1636_v27 }
0x14c1   :  { %1640 = vrot.lane.b32.xlu0 %v1638_v28, %s2779_s13 }
0x152c   :  { %v1739_v31 = vpop.permute.xlu1 %1738 }
0x152d   :  { %v1741_v32 = vadd.f32 %v1739_v31, %v1731_v30 }
0x152f   :  { %2684 = vtanh.f32 %v1741_v32 }
0x1533   :  { %v1641_v8 = vpop.permute.xlu0 %1640 }
0x1534   :  { %v1643_v35 = vadd.f32 %v1641_v8, %v1633_v29 }
0x1536   :  { %2686 = vtanh.f32 %v1643_v35 }
0x1539   :  { %v2685_v36 = vpop.eup %2684 }
0x153a   :  { %1744 = vrot.lane.b32.xlu1 %v2685_v36, %s2779_s13 }
0x1540   :  { %v2687_v51 = vpop.eup %2686 }
0x1541   :  { %1646 = vrot.lane.b32.xlu0 %v2687_v51, %s2779_s13 }
0x15ac   :  { %v1745_v37 = vpop.permute.xlu1 %1744 }
0x15ad   :  { %v1747_v39 = vmul.f32 %v2681_v23, %v1745_v37 }
0x15af   :  { %1749 = vrot.lane.b32.xlu0 %v1747_v39, %s2780_s0 }
0x15b3   :  { %v1647_v40 = vpop.permute.xlu0 %1646 }
0x15b4   :  { %v1649_v41 = vmul.f32 %v2683_v26, %v1647_v40 }
0x15b6   :  { %v1650_v12 = vadd.f32 %v1649_v41, %v3214_v34  ;;  %1753 = vrot.lane.b32.xlu1 %v1649_v41, %s2781_s5 }
0x1621   :  { %v1750_v42 = vpop.permute.xlu0 %1749 }
0x1628   :  { %v1754_v44 = vpop.permute.xlu1 %1753 }
0x1629   :  { %v1756_v56 = vsel %vm224_vm2, %v1750_v42, %v1754_v44 }
0x162a   :  { %2390 = vmatmul.mubr.msk.f32.vlgmr.msra.gmra.mrb[16].mxu1 %vm328_vm3, %v1756_v56 }
0x16fd   :  { %v1826_v45 = vpop.f32.mrb[16].mxu1 }
0x16fe   :  { %v1827_v46 = vadd.f32 %v2996_v60, %v1826_v45  ;;  %v2391_v47 = vpop.f32.mrb[17].mxu1  ;;  %v1856_v60 = vld [vmem:[%s3285_s6] sm:$0xff]  ;;  %s2782_s6 = smov [#allocation7]  }
0x16ff   :  { %v2552_v5 = vpack.c.bf16 %v1857_v3, %v1856_v60 }
0x1700   :  { %2688 = vtanh.f32 %v1827_v46  ;;  %v2005_v50 = vmul.f32 -1.442695, %v1827_v46 }
0x1701   :  { %2553 = vmatpush3.bf16.msra.mxu0 %v2552_v5 }
0x1702   :  { %2690 = vpow2.f32 %v2005_v50  ;;  %2554 = vmatprep.subr.bf16.mxu0 %v2776_v0 }
0x1705   :  { %2556 = vmatpush3.bf16.msra.mxu0 %v2555_v53 }
0x170a   :  { %v2689_v49 = vpop.eup %2688 }
0x170b   :  { %1839 = vrot.lane.b32.xlu0 %v2689_v49, %s2779_s13 }
0x170c   :  { %v2691_v57 = vpop.eup %2690 }
0x170d   :  { %v1833_v52 = vadd.f32 1.0, %v2691_v57 }
0x170f   :  { %2692 = vrcp.f32 %v1833_v52 }
0x1719   :  { %v2693_v58 = vpop.eup %2692 }
0x171a   :  { %v1837_v62 = vmul.f32 %v2693_v58, %v1643_v35 }
0x177d   :  { %v1840_v59 = vpop.permute.xlu0 %1839 }
0x177e   :  { %v1842_v61 = vmul.f32 %v2693_v58, %v1840_v59 }
0x1780   :  { %1844 = vrot.lane.b32.xlu1 %v1842_v61, %s2779_s13 }
0x17f2   :  { %v1845_v63 = vpop.permute.xlu1 %1844 }
0x17f3   :  { %v1847_v2 = vadd.f32 %v1845_v63, %v1837_v62 }
0x17f5   :  { %2694 = vtanh.f32 %v1847_v2 }
0x17ff   :  { %v2695_v7 = vpop.eup %2694 }
0x1800   :  { %1850 = vrot.lane.b32.xlu0 %v2695_v7, %s2779_s13  ;;  %s1955_s13 = sshll.u32 %s2782_s6, 4  ;;  %s1956_s13 = int_to_ptr.vmem [resolvable:$true] %s1955_s13 }
0x1801   :  { %s2744_s29 = scalar_lea.vmem %s1956_s13, 128  ;;  %p2749_p3 = scmp.lt.s32.totalorder %s1956_s13, %s1956_s13 }
0x1802   :  { %p2745_p2 = scmp.ne.s32.totalorder %s1956_s13, %s2744_s29  ;;  %p2750_p4 = scmp.lt.s32.totalorder %s2744_s29, %s2744_s29 }
0x1804   :  { %p2751_p5 = por %p2750_p4, %p2749_p3 }
0x1806   :  { %p2752_p6 = pnand %p2751_p5, %p2745_p2 }
0x1872   :  { %v1851_v9 = vpop.permute.xlu0 %1850 }
0x1873   :  { %v1853_v10 = vmul.f32 %v2693_v58, %v1851_v9 }
0x1875   :  { %v1854_v34 = vadd.f32 %v1853_v10, %v1650_v12 }
0x1877   :  { %v1855_v11 = vmul.f32 0.125, %v1854_v34 }
0x1879   :  { %1868 = vrot.lane.b32.xlu1 %v1855_v11, %s2780_s0 }
0x18eb   :  { %v1869_v14 = vpop.permute.xlu1 %1868 }
0x18ec   :  { %2401 = vmatmul.mubr.msk.f32.vlgmr.msra.gmra.mrb[22].mxu0 %vm224_vm2, %v1869_v14 }
0x19bf   :  { %v1938_v33 = vpop.f32.mrb[22].mxu0 }
0x19c0   :  { %v1939_v38 = vadd.f32 %v2006_v15, %v1938_v33  ;;  %v2402_v0 = vpop.f32.mrb[23].mxu0 }
0x19c2   :  { %v2008_v16 = vmul.f32 -1.442695, %v1939_v38 }
0x19c4   :  { %2696 = vpow2.f32 %v2008_v16 }
0x19ce   :  { %v2697_v17 = vpop.eup %2696 }
0x19cf   :  { %v1945_v18 = vadd.f32 1.0, %v2697_v17 }
0x19d1   :  { %2698 = vrcp.f32 %v1945_v18 }
0x19db   :  { %v2699_v19 = vpop.eup %2698 }
0x19dc   :  { %1948 = vst [vmem:[#allocation7] sm:$0xff] %v2699_v19 }
0x19dd   :  { %2755 = shalt.err (!%p2752_p6)
}
0x19de   :  { %s2756_s28 = scalar_lea.hbm %s3287_s8, 128 }
0x19df   :  { %p2757_p7 = scmp.ne.s32.totalorder %s3287_s8, %s2756_s28  ;;  %p2760_p8 = scmp.lt.u32.totalorder %s2756_s28, %s3287_s8 }
0x19e1   :  { %p2762_p9 = pnand %p2760_p8, %p2757_p7 }
0x19e3   :  { %2765 = shalt.err (!%p2762_p9)
}
0x19e4   :  { %1958 = dma.vmem_to_hbm [thread:$0]  %s1956_s13, 128, %s3287_s8, [#allocation4]  }
0x19e5   :  { %2770 = dma.done.wait [#allocation4], 128  }
0x19e6   :  { %2771 = vsyncadd [#allocation4], 4294967168 }
0x19e7   :  { %1962 = vsyncpa [#allocation3], 1 }
0x19e8   :  { %1963 = vsyncpa [#allocation6], 1 }
0x19e9   :  { %1964 = vsyncpa [#allocation4], 1 }

</bundles_post_ra>
